<compile_context>
chip_gen: v7x
topology: tpu7x:2x2x1
jax: 0.10.0
libtpu: 0.0.40
codegen_flags: <defaults>
</compile_context>

<pallas_src>
import math
import jax
import jax.numpy as jnp
from jax.experimental import pallas as pl
from jax.experimental.pallas import tpu as pltpu

# Small shapes consistent with the module (d_model = 128 per the spec).
S = 8              # sequence length
N = 2              # batch size
E = 128            # d_model
NHEAD = 4          # attention heads
FF = 256           # dim_feedforward (kept small)
HEAD_DIM = E // NHEAD
NS = N * S
B = N * NHEAD      # batch dim of the attention dot_generals


def encoder_layer_kernel(x_ref, wqkv_ref, bqkv_ref, wo_ref, bo_ref,
                         w1_ref, b1_ref, w2_ref, b2_ref, o_ref):
    """Fused encoder layer, single invocation (no grid).

    x_ref:    (N*S, E) f32 activations, batch-major rows (row = n*S + s)
    wqkv_ref: (E, 3E)  bf16, columns [q|k|v], 1/sqrt(hd) folded into the q part
    bqkv_ref: (1, 3E)  f32 (q part pre-scaled)
    wo_ref:   (E, E)   bf16 (out_proj.weight.T);  bo_ref: (1, E) f32
    w1_ref:   (E, FF)  bf16;  b1_ref: (1, FF) f32
    w2_ref:   (FF, E)  bf16;  b2_ref: (1, E)  f32
    """
    x = x_ref[...]                                         # (NS, E) f32
    xb = x.astype(jnp.bfloat16)

    # --- packed QKV projection: one (NS,128)@(128,384) MXU matmul, f32 accum ---
    qkv = jnp.dot(xb, wqkv_ref[...],
                  preferred_element_type=jnp.float32) + bqkv_ref[...]   # (NS, 3E)

    # (NS, E) -> (NHEAD*N, S, hd), batch index b = h*N + n.
    # Only a leading-dims transpose (the 32-lane dim stays minor).
    def to_heads(m):
        m = m.reshape(NS, NHEAD, HEAD_DIM)
        m = jnp.transpose(m, (1, 0, 2))                    # (H, N*S, hd)
        return m.reshape(B, S, HEAD_DIM)                   # rows are batch-major

    q = to_heads(qkv[:, 0 * E:1 * E]).astype(jnp.bfloat16)   # scale pre-folded
    k = to_heads(qkv[:, 1 * E:2 * E]).astype(jnp.bfloat16)
    v = to_heads(qkv[:, 2 * E:3 * E]).astype(jnp.bfloat16)

    # --- attention: batched dot_generals over B = N*NHEAD = 8 ---
    sc = jnp.einsum('bqd,bkd->bqk', q, k,
                    preferred_element_type=jnp.float32)    # (B, S, S) f32
    sc = sc - jnp.max(sc, axis=-1, keepdims=True)
    p = jnp.exp(sc)
    p = p / jnp.sum(p, axis=-1, keepdims=True)             # exact divide (8 keys)
    ctx = jnp.einsum('bqk,bkd->bqd', p.astype(jnp.bfloat16), v,
                     preferred_element_type=jnp.float32)   # (B, S, hd) f32

    # --- reassemble heads along lanes; single K=128 out-projection ---
    ctx = ctx.reshape(NHEAD, NS, HEAD_DIM)
    ctx = jnp.transpose(ctx, (1, 0, 2)).reshape(NS, E)     # cols = h*hd + d
    attn = jnp.dot(ctx.astype(jnp.bfloat16), wo_ref[...],
                   preferred_element_type=jnp.float32) + bo_ref[...]

    src = x + attn                                         # residual 1 (dropout1=id)

    # --- FFN: (NS,128)@(128,256) -> relu -> (NS,256)@(256,128) ---
    h1 = jnp.maximum(
        jnp.dot(src.astype(jnp.bfloat16), w1_ref[...],
                preferred_element_type=jnp.float32) + b1_ref[...], 0.0)
    ffn = jnp.dot(h1.astype(jnp.bfloat16), w2_ref[...],
                  preferred_element_type=jnp.float32) + b2_ref[...]
    o_ref[...] = src + ffn                                 # residual 2 (dropout2=id)


def prepare_params(w_in, b_in, w_out, b_out, w1, b1, w2, b2):
    """One-time weight re-layout, hoisted OUT of the per-call forward path:
    pack QKV into one (E,3E) weight / (1,3E) bias with 1/sqrt(hd) folded into the
    q part, pre-transpose all linear weights, and cast matmul weights to bf16."""
    scale = 1.0 / math.sqrt(HEAD_DIM)
    col_scale = jnp.concatenate(
        [jnp.full((E,), scale, jnp.float32), jnp.ones((2 * E,), jnp.float32)])
    w_qkv = (w_in.T * col_scale[None, :]).astype(jnp.bfloat16)     # (E, 3E)
    b_qkv = (b_in * col_scale).reshape(1, 3 * E)                   # (1, 3E) f32
    w_o = w_out.T.astype(jnp.bfloat16)                             # (E, E)
    b_o = b_out.reshape(1, E)
    w_1 = w1.T.astype(jnp.bfloat16)                                # (E, FF)
    b_1 = b1.reshape(1, FF)
    w_2 = w2.T.astype(jnp.bfloat16)                                # (FF, E)
    b_2 = b2.reshape(1, E)
    return (w_qkv, b_qkv, w_o, b_o, w_1, b_1, w_2, b_2)


@jax.jit
def transformer_encoder_layer(x_sne, w_qkv, b_qkv, w_o, b_o, w_1, b_1, w_2, b_2):
    """x_sne: (S, N, E) f32 (PyTorch MHA layout). Returns (S, N, E) f32."""
    x_flat = jnp.transpose(x_sne, (1, 0, 2)).reshape(NS, E)   # batch-major rows
    vmem = lambda: pl.BlockSpec(memory_space=pltpu.MemorySpace.VMEM)
    out = pl.pallas_call(
        encoder_layer_kernel,
        out_shape=jax.ShapeDtypeStruct((NS, E), jnp.float32),
        in_specs=[vmem() for _ in range(9)],
        out_specs=vmem(),
    )(x_flat, w_qkv, b_qkv, w_o, b_o, w_1, b_1, w_2, b_2)
    return jnp.transpose(out.reshape(N, S, E), (1, 0, 2))


def reference(x, w_in, b_in, w_out, b_out, w1, b1, w2, b2):
    """Pure-f32 JAX reference mirroring torch.nn.MultiheadAttention + FFN (eval)."""
    qkv = jnp.einsum('sne,fe->snf', x, w_in) + b_in            # (S, N, 3E)
    q, k, v = jnp.split(qkv, 3, axis=-1)
    q = q.reshape(S, N, NHEAD, HEAD_DIM) / math.sqrt(HEAD_DIM)
    k = k.reshape(S, N, NHEAD, HEAD_DIM)
    v = v.reshape(S, N, NHEAD, HEAD_DIM)
    scores = jnp.einsum('qnhd,knhd->nhqk', q, k)
    p = jax.nn.softmax(scores, axis=-1)
    o = jnp.einsum('nhqk,knhd->qnhd', p, v).reshape(S, N, E)
    src = x + (o @ w_out.T + b_out)
    h1 = jax.nn.relu(src @ w1.T + b1)
    return src + (h1 @ w2.T + b2)


if __name__ == "__main__":
    key = jax.random.PRNGKey(0)
    keys = jax.random.split(key, 9)

    x = jax.random.normal(keys[0], (S, N, E), dtype=jnp.float32)

    # Deterministic parameter init; shapes match MultiheadAttention
    # (in_proj_weight/bias, out_proj) and the two Linear layers.
    def init(k, shape, fan_in):
        return jax.random.normal(k, shape, dtype=jnp.float32) / math.sqrt(fan_in)

    w_in = init(keys[1], (3 * E, E), E)
    b_in = init(keys[2], (3 * E,), E)
    w_out = init(keys[3], (E, E), E)
    b_out = init(keys[4], (E,), E)
    w1 = init(keys[5], (FF, E), E)
    b1 = init(keys[6], (FF,), E)
    w2 = init(keys[7], (E, FF), FF)
    b2 = init(keys[8], (E,), FF)

    # One-time layout/dtype prep (outside the jitted per-call forward path).
    params = prepare_params(w_in, b_in, w_out, b_out, w1, b1, w2, b2)

    out = transformer_encoder_layer(x, *params)
    out = jax.block_until_ready(out)

    ref = reference(x, w_in, b_in, w_out, b_out, w1, b1, w2, b2)
    assert out.shape == (S, N, E)
    # Tolerance documents the accepted bf16 error: all matmul operands are bf16
    # (f32 accumulation) while the reference is exact f32; outputs have std ~1.7
    # and |.| up to ~6, so 5e-2 absolute is well above the accumulated rounding
    # noise but far below any real mismatch.
    assert jnp.allclose(out, ref, rtol=3e-2, atol=5e-2), "mismatch vs reference"

    print("KERNEL_OK")
</pallas_src>

<mosaic_0001>
module attributes {stable_mosaic.version = 11 : i64} {
  func.func @encoder_layer_kernel(%arg0: memref<16x128xf32, #tpu.memory_space<vmem>>, %arg1: memref<128x384xbf16, #tpu.memory_space<vmem>>, %arg2: memref<1x384xf32, #tpu.memory_space<vmem>>, %arg3: memref<128x128xbf16, #tpu.memory_space<vmem>>, %arg4: memref<1x128xf32, #tpu.memory_space<vmem>>, %arg5: memref<128x256xbf16, #tpu.memory_space<vmem>>, %arg6: memref<1x256xf32, #tpu.memory_space<vmem>>, %arg7: memref<256x128xbf16, #tpu.memory_space<vmem>>, %arg8: memref<1x128xf32, #tpu.memory_space<vmem>>, %arg9: memref<16x128xf32, #tpu.memory_space<vmem>>) attributes {dimension_semantics = [], scalar_prefetch = 0 : i64, scratch_operands = 0 : i64, tpu.core_type = #tpu.core_type<tc>} {
    %c0 = arith.constant 0 : index
    %c0_0 = arith.constant 0 : index
    %0 = vector.load %arg0[%c0, %c0_0] : memref<16x128xf32, #tpu.memory_space<vmem>>, vector<16x128xf32>
    %1 = arith.truncf %0 : vector<16x128xf32> to vector<16x128xbf16>
    %c0_1 = arith.constant 0 : index
    %c0_2 = arith.constant 0 : index
    %2 = vector.load %arg1[%c0_1, %c0_2] : memref<128x384xbf16, #tpu.memory_space<vmem>>, vector<128x384xbf16>
    %cst = arith.constant dense<0.000000e+00> : vector<16x384xf32>
    %3 = tpu.matmul %1, %2, %cst {dimension_numbers = #tpu.dot_dimension_numbers<[1], [0], [0], [1], [0, 0, 1, 1], [], []>} : vector<16x128xbf16>, vector<128x384xbf16>, vector<16x384xf32> -> vector<16x384xf32>
    %c0_3 = arith.constant 0 : index
    %c0_4 = arith.constant 0 : index
    %4 = vector.load %arg2[%c0_3, %c0_4] : memref<1x384xf32, #tpu.memory_space<vmem>>, vector<1x384xf32>
    %5 = vector.broadcast %4 : vector<1x384xf32> to vector<16x384xf32>
    %6 = arith.addf %3, %5 : vector<16x384xf32>
    %7 = vector.extract_strided_slice %6 {offsets = [0, 0], sizes = [16, 128], strides = [1, 1]} : vector<16x384xf32> to vector<16x128xf32>
    %8 = vector.shape_cast %7 : vector<16x128xf32> to vector<16x4x32xf32>
    %9 = tpu.transpose %8, [1, 0, 2] : vector<16x4x32xf32> -> vector<4x16x32xf32>
    %10 = vector.shape_cast %9 : vector<4x16x32xf32> to vector<8x8x32xf32>
    %11 = arith.truncf %10 : vector<8x8x32xf32> to vector<8x8x32xbf16>
    %12 = vector.extract_strided_slice %6 {offsets = [0, 128], sizes = [16, 128], strides = [1, 1]} : vector<16x384xf32> to vector<16x128xf32>
    %13 = vector.shape_cast %12 : vector<16x128xf32> to vector<16x4x32xf32>
    %14 = tpu.transpose %13, [1, 0, 2] : vector<16x4x32xf32> -> vector<4x16x32xf32>
    %15 = vector.shape_cast %14 : vector<4x16x32xf32> to vector<8x8x32xf32>
    %16 = arith.truncf %15 : vector<8x8x32xf32> to vector<8x8x32xbf16>
    %17 = vector.extract_strided_slice %6 {offsets = [0, 256], sizes = [16, 128], strides = [1, 1]} : vector<16x384xf32> to vector<16x128xf32>
    %18 = vector.shape_cast %17 : vector<16x128xf32> to vector<16x4x32xf32>
    %19 = tpu.transpose %18, [1, 0, 2] : vector<16x4x32xf32> -> vector<4x16x32xf32>
    %20 = vector.shape_cast %19 : vector<4x16x32xf32> to vector<8x8x32xf32>
    %21 = arith.truncf %20 : vector<8x8x32xf32> to vector<8x8x32xbf16>
    "tpu.trace_start"() <{level = 10 : i32, message = "bqd,bkd->bqk"}> : () -> ()
    %cst_5 = arith.constant dense<0.000000e+00> : vector<8x8x8xf32>
    %22 = tpu.matmul %11, %16, %cst_5 {dimension_numbers = #tpu.dot_dimension_numbers<[2], [2], [1], [1], [0, 0, 0, 1, 1, 1], [0], [0]>} : vector<8x8x32xbf16>, vector<8x8x32xbf16>, vector<8x8x8xf32> -> vector<8x8x8xf32>
    "tpu.trace_stop"() : () -> ()
    %cst_6 = arith.constant dense<0xFF800000> : vector<8x8xf32>
    %23 = vector.multi_reduction <maximumf>, %22, %cst_6 [2] : vector<8x8x8xf32> to vector<8x8xf32>
    %24 = vector.shape_cast %23 : vector<8x8xf32> to vector<8x8x1xf32>
    %25 = vector.broadcast %24 : vector<8x8x1xf32> to vector<8x8x8xf32>
    %26 = arith.subf %22, %25 : vector<8x8x8xf32>
    %27 = math.exp %26 : vector<8x8x8xf32>
    %cst_7 = arith.constant dense<0.000000e+00> : vector<8x8xf32>
    %28 = vector.multi_reduction <add>, %27, %cst_7 [2] : vector<8x8x8xf32> to vector<8x8xf32>
    %29 = vector.shape_cast %28 : vector<8x8xf32> to vector<8x8x1xf32>
    %30 = vector.broadcast %29 : vector<8x8x1xf32> to vector<8x8x8xf32>
    %31 = arith.divf %27, %30 : vector<8x8x8xf32>
    %32 = arith.truncf %31 : vector<8x8x8xf32> to vector<8x8x8xbf16>
    "tpu.trace_start"() <{level = 10 : i32, message = "bqk,bkd->bqd"}> : () -> ()
    %cst_8 = arith.constant dense<0.000000e+00> : vector<8x8x32xf32>
    %33 = tpu.matmul %32, %21, %cst_8 {dimension_numbers = #tpu.dot_dimension_numbers<[2], [1], [1], [2], [0, 0, 0, 1, 1, 2], [0], [0]>} : vector<8x8x8xbf16>, vector<8x8x32xbf16>, vector<8x8x32xf32> -> vector<8x8x32xf32>
    "tpu.trace_stop"() : () -> ()
    %34 = vector.shape_cast %33 : vector<8x8x32xf32> to vector<4x16x32xf32>
    %35 = tpu.transpose %34, [1, 0, 2] : vector<4x16x32xf32> -> vector<16x4x32xf32>
    %36 = vector.shape_cast %35 : vector<16x4x32xf32> to vector<16x128xf32>
    %37 = arith.truncf %36 : vector<16x128xf32> to vector<16x128xbf16>
    %c0_9 = arith.constant 0 : index
    %c0_10 = arith.constant 0 : index
    %38 = vector.load %arg3[%c0_9, %c0_10] : memref<128x128xbf16, #tpu.memory_space<vmem>>, vector<128x128xbf16>
    %cst_11 = arith.constant dense<0.000000e+00> : vector<16x128xf32>
    %39 = tpu.matmul %37, %38, %cst_11 {dimension_numbers = #tpu.dot_dimension_numbers<[1], [0], [0], [1], [0, 0, 1, 1], [], []>} : vector<16x128xbf16>, vector<128x128xbf16>, vector<16x128xf32> -> vector<16x128xf32>
    %c0_12 = arith.constant 0 : index
    %c0_13 = arith.constant 0 : index
    %40 = vector.load %arg4[%c0_12, %c0_13] : memref<1x128xf32, #tpu.memory_space<vmem>>, vector<1x128xf32>
    %41 = vector.broadcast %40 : vector<1x128xf32> to vector<16x128xf32>
    %42 = arith.addf %39, %41 : vector<16x128xf32>
    %43 = arith.addf %0, %42 : vector<16x128xf32>
    %44 = arith.truncf %43 : vector<16x128xf32> to vector<16x128xbf16>
    %c0_14 = arith.constant 0 : index
    %c0_15 = arith.constant 0 : index
    %45 = vector.load %arg5[%c0_14, %c0_15] : memref<128x256xbf16, #tpu.memory_space<vmem>>, vector<128x256xbf16>
    %cst_16 = arith.constant dense<0.000000e+00> : vector<16x256xf32>
    %46 = tpu.matmul %44, %45, %cst_16 {dimension_numbers = #tpu.dot_dimension_numbers<[1], [0], [0], [1], [0, 0, 1, 1], [], []>} : vector<16x128xbf16>, vector<128x256xbf16>, vector<16x256xf32> -> vector<16x256xf32>
    %c0_17 = arith.constant 0 : index
    %c0_18 = arith.constant 0 : index
    %47 = vector.load %arg6[%c0_17, %c0_18] : memref<1x256xf32, #tpu.memory_space<vmem>>, vector<1x256xf32>
    %48 = vector.broadcast %47 : vector<1x256xf32> to vector<16x256xf32>
    %49 = arith.addf %46, %48 : vector<16x256xf32>
    %cst_19 = arith.constant 0.000000e+00 : f32
    %50 = vector.broadcast %cst_19 : f32 to vector<16x256xf32>
    %51 = arith.maximumf %49, %50 : vector<16x256xf32>
    %52 = arith.truncf %51 : vector<16x256xf32> to vector<16x256xbf16>
    %c0_20 = arith.constant 0 : index
    %c0_21 = arith.constant 0 : index
    %53 = vector.load %arg7[%c0_20, %c0_21] : memref<256x128xbf16, #tpu.memory_space<vmem>>, vector<256x128xbf16>
    %cst_22 = arith.constant dense<0.000000e+00> : vector<16x128xf32>
    %54 = tpu.matmul %52, %53, %cst_22 {dimension_numbers = #tpu.dot_dimension_numbers<[1], [0], [0], [1], [0, 0, 1, 1], [], []>} : vector<16x256xbf16>, vector<256x128xbf16>, vector<16x128xf32> -> vector<16x128xf32>
    %c0_23 = arith.constant 0 : index
    %c0_24 = arith.constant 0 : index
    %55 = vector.load %arg8[%c0_23, %c0_24] : memref<1x128xf32, #tpu.memory_space<vmem>>, vector<1x128xf32>
    %56 = vector.broadcast %55 : vector<1x128xf32> to vector<16x128xf32>
    %57 = arith.addf %54, %56 : vector<16x128xf32>
    %58 = arith.addf %43, %57 : vector<16x128xf32>
    %c0_25 = arith.constant 0 : index
    %c0_26 = arith.constant 0 : index
    %59 = vector.load %arg9[%c0_25, %c0_26] : memref<16x128xf32, #tpu.memory_space<vmem>>, vector<16x128xf32>
    tpu.vector_store %arg9[%c0_25, %c0_26], %58 {strides = array<i32>} : memref<16x128xf32, #tpu.memory_space<vmem>>, vector<16x128xf32>,
    return
  }
}

</mosaic_0001>

<bundles_post_ra>
// kernel: transformer_encoder_layer.1
= control target key start
LH: loop header
LB: loop body
LE: loop exit
PB: predicated region body
PF: predicated region fallthrough
CT: control target
= control target key end

     0   :  { %14 = vsyncpa [#allocation3], 0  ;;  %s3995_s0 = inlined_call_operand.vmem [shape: f32[16,128], index: 0, kind: input, shape index: {}]   ;;  %s3996_s1 = inlined_call_operand.hbm [shape: bf16[128,384], index: 1, kind: input, shape index: {}]   ;;  %s3997_s2 = inlined_call_operand.vmem [shape: f32[1,384], index: 2, kind: input, shape index: {}]   ;;  %s3998_s3 = inlined_call_operand.hbm [shape: bf16[128,128], index: 3, kind: input, shape index: {}]   ;;  %s3999_s4 = inlined_call_operand.vmem [shape: f32[1,128], index: 4, kind: input, shape index: {}]   ;;  %s4000_s5 = inlined_call_operand.hbm [shape: bf16[128,256], index: 5, kind: input, shape index: {}]   ;;  %s4001_s6 = inlined_call_operand.vmem [shape: f32[1,256], index: 6, kind: input, shape index: {}]   ;;  %s4002_s7 = inlined_call_operand.hbm [shape: bf16[256,128], index: 7, kind: input, shape index: {}]   ;;  %s4003_s8 = inlined_call_operand.vmem [shape: f32[1,128], index: 8, kind: input, shape index: {}]   ;;  %s4004_s9 = inlined_call_operand.vmem [shape: f32[16,128], index: 9, kind: output, shape index: {}]  }
   0x1   :  { %15 = vsyncpa [#allocation5], 0 }
   0x2   :  { %16 = vsyncpa [#allocation8], 0  ;;  %s3397_s30 = smov [#allocation4]   ;;  %s3303_s13 = scalar_lea.hbm %s3998_s3, 1024 }
   0x3   :  { %s38_s10 = sshll.u32 %s3397_s30, 4  ;;  %p3304_p0 = scmp.ne.s32.totalorder %s3998_s3, %s3303_s13  ;;  %s39_s10 = int_to_ptr.vmem [resolvable:$true] %s38_s10 }
   0x4   :  { %p3307_p1 = scmp.lt.u32.totalorder %s3303_s13, %s3998_s3 }
   0x6   :  { %p3309_p2 = pnand %p3307_p1, %p3304_p0 }
   0x8   :  { %3312 = shalt.err (!%p3309_p2)
}
   0x9   :  { %s3313_s18 = scalar_lea.vmem %s39_s10, 1024  ;;  %p3318_p4 = scmp.lt.s32.totalorder %s39_s10, %s39_s10 }
   0xa   :  { %p3314_p3 = scmp.ne.s32.totalorder %s39_s10, %s3313_s18  ;;  %p3319_p5 = scmp.lt.s32.totalorder %s3313_s18, %s3313_s18 }
   0xc   :  { %p3320_p6 = por %p3319_p5, %p3318_p4 }
   0xe   :  { %p3321_p7 = pnand %p3320_p6, %p3314_p3 }
  0x10   :  { %3324 = shalt.err (!%p3321_p7)
}
  0x11   :  { %s3398_s19 = smov 64   ;;  %s3399_s20 = smov 4  }
  0x12   :  { %44 = dma.hbm_to_vmem [thread:$0]  %s3998_s3, 1024, %s39_s10, [#allocation5], %s3398_s19, %s3398_s19, %s3399_s20  }
  0x13   :  { %s3400_s23 = smov [#allocation2]   ;;  %s3325_s27 = scalar_lea.hbm %s3996_s1, 3072 }
  0x14   :  { %s24_s24 = sshll.u32 %s3400_s23, 4  ;;  %p3326_p8 = scmp.ne.s32.totalorder %s3996_s1, %s3325_s27  ;;  %s25_s24 = int_to_ptr.vmem [resolvable:$true] %s24_s24 }
  0x15   :  { %p3329_p9 = scmp.lt.u32.totalorder %s3325_s27, %s3996_s1 }
  0x17   :  { %p3331_p10 = pnand %p3329_p9, %p3326_p8 }
  0x19   :  { %3334 = shalt.err (!%p3331_p10)
}
  0x1a   :  { %s3335_s12 = scalar_lea.vmem %s25_s24, 3072  ;;  %p3340_p12 = scmp.lt.s32.totalorder %s25_s24, %s25_s24 }
  0x1b   :  { %p3336_p11 = scmp.ne.s32.totalorder %s25_s24, %s3335_s12  ;;  %p3341_p13 = scmp.lt.s32.totalorder %s3335_s12, %s3335_s12 }
  0x1d   :  { %p3342_p0 = por %p3341_p13, %p3340_p12 }
  0x1f   :  { %p3343_p1 = pnand %p3342_p0, %p3336_p11 }
  0x21   :  { %3346 = shalt.err (!%p3343_p1)
}
  0x22   :  { %s3401_s3 = smov 192   ;;  %s3402_s10 = smov 12  }
  0x23   :  { %30 = dma.hbm_to_vmem [thread:$0]  %s3996_s1, 3072, %s25_s24, [#allocation3], %s3401_s3, %s3401_s3, %s3402_s10  }
  0x24   :  { %s3403_s15 = smov [#allocation6]   ;;  %s3347_s21 = scalar_lea.hbm %s4000_s5, 2048 }
  0x25   :  { %s52_s16 = sshll.u32 %s3403_s15, 4  ;;  %p3348_p2 = scmp.ne.s32.totalorder %s4000_s5, %s3347_s21  ;;  %s53_s16 = int_to_ptr.vmem [resolvable:$true] %s52_s16 }
  0x26   :  { %p3351_p3 = scmp.lt.u32.totalorder %s3347_s21, %s4000_s5 }
  0x28   :  { %p3353_p4 = pnand %p3351_p3, %p3348_p2 }
  0x2a   :  { %3356 = shalt.err (!%p3353_p4)
}
  0x2b   :  { %s3357_s27 = scalar_lea.vmem %s53_s16, 2048  ;;  %p3362_p6 = scmp.lt.s32.totalorder %s53_s16, %s53_s16 }
  0x2c   :  { %p3358_p5 = scmp.ne.s32.totalorder %s53_s16, %s3357_s27  ;;  %p3363_p7 = scmp.lt.s32.totalorder %s3357_s27, %s3357_s27 }
  0x2e   :  { %p3364_p8 = por %p3363_p7, %p3362_p6 }
  0x30   :  { %p3365_p9 = pnand %p3364_p8, %p3358_p5 }
  0x32   :  { %3368 = shalt.err (!%p3365_p9)
}
  0x33   :  { %s3404_s1 = smov 128   ;;  %s3405_s24 = smov 8  }
  0x34   :  { %58 = dma.hbm_to_vmem [thread:$0]  %s4000_s5, 2048, %s53_s16, [#allocation5], %s3404_s1, %s3404_s1, %s3405_s24  }
  0x35   :  { %s3406_s30 = smov [#allocation7]   ;;  %s3369_s10 = scalar_lea.hbm %s4002_s7, 2048 }
  0x36   :  { %s66_s11 = sshll.u32 %s3406_s30, 4  ;;  %p3370_p10 = scmp.ne.s32.totalorder %s4002_s7, %s3369_s10  ;;  %s67_s11 = int_to_ptr.vmem [resolvable:$true] %s66_s11 }
  0x37   :  { %p3373_p11 = scmp.lt.u32.totalorder %s3369_s10, %s4002_s7 }
  0x39   :  { %p3375_p12 = pnand %p3373_p11, %p3370_p10 }
  0x3b   :  { %3378 = shalt.err (!%p3375_p12)
}
  0x3c   :  { %s3379_s18 = scalar_lea.vmem %s67_s11, 2048  ;;  %p3384_p0 = scmp.lt.s32.totalorder %s67_s11, %s67_s11 }
  0x3d   :  { %p3380_p13 = scmp.ne.s32.totalorder %s67_s11, %s3379_s18  ;;  %p3385_p1 = scmp.lt.s32.totalorder %s3379_s18, %s3379_s18 }
  0x3f   :  { %p3386_p2 = por %p3385_p1, %p3384_p0 }
  0x41   :  { %p3387_p3 = pnand %p3386_p2, %p3380_p13 }
  0x43   :  { %3390 = shalt.err (!%p3387_p3)
}
  0x44   :  { %72 = dma.hbm_to_vmem [thread:$0]  %s4002_s7, 2048, %s67_s11, [#allocation8], %s3398_s19, %s3398_s19, %s3399_s20  }
  0x45   :  { %3391 = dma.done.wait [#allocation3], 3072  }
  0x46   :  { %3392 = vsyncadd [#allocation3], 4294964224 }
  0x47   :  { %3393 = dma.done.wait [#allocation5], 3072  }
  0x48   :  { %3394 = vsyncadd [#allocation5], 4294964224 }
  0x49   :  { %3395 = dma.done.wait [#allocation8], 2048  }
  0x4a   :  { %3396 = vsyncadd [#allocation8], 4294965248  ;;  %v3407_v0 = vmov 0   ;;  %v3189_v1 = vld [vmem:[#allocation2 + $0x4] ss:$12 sps:$4 sm:$0xff]   ;;  %v89_v18 = vld [vmem:[%s3995_s0 + $0x8] sm:$0xff]  ;;  %v125_v29 = vlaneseq }
  0x4b   :  { %300 = vmatprep.mubr.bf16.mxu0 %v3407_v0  ;;  %v3191_v2 = vld [vmem:[#allocation2] ss:$12 sps:$4 sm:$0xff]   ;;  %268 = vmatprep.subr.bf16.mxu0 %v3189_v1  ;;  %v3192_v3 = vld [vmem:[#allocation2 + $0x1c] ss:$12 sps:$4 sm:$0xff]   ;;  %v3194_v4 = vld [vmem:[#allocation2 + $0x18] ss:$12 sps:$4 sm:$0xff]  }
  0x4c   :  { %269 = vmatpush1.bf16.msra.mxu0 %v3191_v2  ;;  %v3195_v5 = vld [vmem:[#allocation2 + $0x34] ss:$12 sps:$4 sm:$0xff]   ;;  %v3197_v6 = vld [vmem:[#allocation2 + $0x30] ss:$12 sps:$4 sm:$0xff]   ;;  %v3198_v7 = vld [vmem:[#allocation2 + $0x4c] ss:$12 sps:$4 sm:$0xff]  }
  0x4d   :  { %270 = vmatprep.subr.bf16.mxu0 %v3192_v3  ;;  %v3200_v8 = vld [vmem:[#allocation2 + $0x48] ss:$12 sps:$4 sm:$0xff]   ;;  %v3201_v9 = vld [vmem:[#allocation2 + $0x64] ss:$12 sps:$4 sm:$0xff]   ;;  %v3203_v10 = vld [vmem:[#allocation2 + $0x60] ss:$12 sps:$4 sm:$0xff]  }
  0x4e   :  { %v3204_v11 = vld [vmem:[#allocation2 + $0x7c] ss:$12 sps:$4 sm:$0xff]   ;;  %v3206_v12 = vld [vmem:[#allocation2 + $0x78] ss:$12 sps:$4 sm:$0xff]   ;;  %v3207_v13 = vld [vmem:[#allocation2 + $0x94] ss:$12 sps:$4 sm:$0xff]  }
  0x4f   :  { %v3209_v14 = vld [vmem:[#allocation2 + $0x90] ss:$12 sps:$4 sm:$0xff]   ;;  %v3210_v15 = vld [vmem:[#allocation2 + $0xac] ss:$12 sps:$4 sm:$0xff]   ;;  %v3212_v16 = vld [vmem:[#allocation2 + $0xa8] ss:$12 sps:$4 sm:$0xff]  }
  0x50   :  { %271 = vmatpush1.bf16.msra.mxu0 %v3194_v4  ;;  %v88_v17 = vld [vmem:[%s3995_s0] sm:$0xff]  ;;  %v3213_v20 = vld [vmem:[#allocation2 + $0x8] ss:$12 sps:$4 sm:$0xff]   ;;  %v3408_v21 = vmov 0.0   ;;  %vm3409_vm0 = vmmov 0   ;;  %v3541_v30 = vshrl.u32 %v125_v29, 7 }
  0x51   :  { %272 = vmatprep.subr.bf16.mxu0 %v3195_v5  ;;  %v90_v19 = vpack.c.bf16 %v89_v18, %v88_v17  ;;  %3021 = vmatprep.subr.bf16.mxu1 %v3408_v21  ;;  %v3214_v22 = vld [vmem:[#allocation2 + $0x20] ss:$12 sps:$4 sm:$0xff]   ;;  %v3215_v23 = vld [vmem:[#allocation2 + $0x38] ss:$12 sps:$4 sm:$0xff]   ;;  %v3216_v24 = vld [vmem:[#allocation2 + $0x50] ss:$12 sps:$4 sm:$0xff]  }
  0x52   :  { %3037 = vmatprep.mubr.msk.bf16.mxu1 %vm3409_vm0, %v3408_v21  ;;  %3022 = vmatpush3.bf16.msra.mxu1 %v3213_v20  ;;  %v3217_v25 = vld [vmem:[#allocation2 + $0x68] ss:$12 sps:$4 sm:$0xff]   ;;  %v3218_v26 = vld [vmem:[#allocation2 + $0x80] ss:$12 sps:$4 sm:$0xff]   ;;  %v3219_v27 = vld [vmem:[#allocation2 + $0x98] ss:$12 sps:$4 sm:$0xff]  }
  0x53   :  { %3023 = vmatprep.subr.bf16.mxu1 %v3408_v21  ;;  %v3220_v28 = vld [vmem:[#allocation2 + $0xb0] ss:$12 sps:$4 sm:$0xff]   ;;  %v127_v31 = vsub.s32 0, %v3541_v30  ;;  %v3547_v32 = vld [vmem:[%s3997_s2] sm:$0x7]  ;;  %v131_v34 = vsub.s32 1, %v3541_v30 }
  0x54   :  { %273 = vmatpush1.bf16.msra.mxu0 %v3197_v6  ;;  %s3410_s26 = smov 96   ;;  %s3411_s2 = smov 32   ;;  %v3412_v44 = vmov 1983009808   ;;  %v3413_v48 = vmov 1934713408  }
  0x55   :  { %274 = vmatprep.subr.bf16.mxu0 %v3198_v7  ;;  %v128_v33 = vrot.slane %v3547_v32, %v127_v31  ;;  %v132_v37 = vrot.slane %v3547_v32, %v131_v34  ;;  %v375_v45 = vunpack.c.l.s4 %v3412_v44  ;;  %v407_v49 = vunpack.c.l.s4 %v3413_v48 }
  0x56   :  { %3024 = vmatpush3.bf16.msra.mxu1 %v3214_v22  ;;  %vm1252_vm1 = vcmask 261120   ;;  %vm1621_vm2 = vcmask 64512   ;;  %vm1721_vm3 = vcmask 1043456   ;;  %vm2385_vm4 = vcmask 523264  }
  0x57   :  { %3025 = vmatprep.subr.bf16.mxu1 %v3408_v21  ;;  %v376_v50 = vunpack.c.0.s8 %v375_v45  ;;  %v408_v53 = vunpack.c.0.s8 %v407_v49  ;;  %vm2388_vm5 = vcmask 785408  }
  0x58   :  { %275 = vmatpush1.bf16.msra.mxu0 %v3200_v8 }
  0x59   :  { %276 = vmatprep.subr.bf16.mxu0 %v3201_v9  ;;  %v3579_v56 = vsub.s32 %v376_v50, %v3541_v30  ;;  %v3582_v2 = vsub.s32 %v408_v53, %v3541_v30 }
  0x5a   :  { %3026 = vmatpush3.bf16.msra.mxu1 %v3215_v23 }
  0x5b   :  { %3027 = vmatprep.subr.bf16.mxu1 %v3408_v21 }
  0x5c   :  { %277 = vmatpush1.bf16.msra.mxu0 %v3203_v10 }
  0x5d   :  { %278 = vmatprep.subr.bf16.mxu0 %v3204_v11 }
  0x5e   :  { %3028 = vmatpush3.bf16.msra.mxu1 %v3216_v24 }
  0x5f   :  { %3029 = vmatprep.subr.bf16.mxu1 %v3408_v21 }
  0x60   :  { %279 = vmatpush1.bf16.msra.mxu0 %v3206_v12 }
  0x61   :  { %280 = vmatprep.subr.bf16.mxu0 %v3207_v13 }
  0x62   :  { %3030 = vmatpush3.bf16.msra.mxu1 %v3217_v25 }
  0x63   :  { %3031 = vmatprep.subr.bf16.mxu1 %v3408_v21 }
  0x64   :  { %281 = vmatpush1.bf16.msra.mxu0 %v3209_v14 }
  0x65   :  { %282 = vmatprep.subr.bf16.mxu0 %v3210_v15 }
  0x66   :  { %3032 = vmatpush3.bf16.msra.mxu1 %v3218_v26 }
  0x67   :  { %3033 = vmatprep.subr.bf16.mxu1 %v3408_v21 }
  0x68   :  { %283 = vmatpush1.bf16.msra.mxu0 %v3212_v16 }
  0x69   :  { %3065 = vmatprep.subr.bf16.mxu0 %v3408_v21 }
  0x6a   :  { %3034 = vmatpush3.bf16.msra.mxu1 %v3219_v27 }
  0x6b   :  { %301 = vmatmul.mubr.bf16.vlgmr.msra.gmra.mrb[0].mxu0 %v90_v19  ;;  %3035 = vmatprep.subr.bf16.mxu1 %v3408_v21 }
  0x6c   :  { %3067 = vmatprep.mubr.msk.bf16.mxu0 %vm3409_vm0, %v3408_v21 }
  0x6e   :  { %3036 = vmatpush3.bf16.msra.mxu1 %v3220_v28 }
  0x6f   :  { %3041 = vmatprep.subr.bf16.mxu1 %v3408_v21 }
  0x71   :  { %3038 = vmatmul.mubr.bf16.vlgmr.msra.gmra.mrb[0].mxu1 %v90_v19 }
  0x72   :  { %3043 = vmatprep.mubr.msk.bf16.mxu1 %vm3409_vm0, %v3408_v21 }
 0x13e   :  { %v302_v35 = vpop.f32.mrb[0].mxu0 }
 0x13f   :  { %v303_v36 = vadd.f32 %v302_v35, %v128_v33  ;;  %v304_v38 = vpop.f32.mrb[1].mxu0 }
 0x140   :  { %v306_v39 = vpop.f32.mrb[2].mxu0  ;;  %v305_v41 = vadd.f32 %v304_v38, %v132_v37 }
 0x141   :  { %v308_v40 = vpop.f32.mrb[3].mxu0  ;;  %360 = vrot.lane.b32.xlu0 %v303_v36, %s3398_s19  ;;  %354 = vrot.lane.b32.xlu1 %v303_v36, %s3410_s26  ;;  %v3568_v43 = vadd.f32 %v306_v39, %v128_v33 }
 0x142   :  { %v3562_v42 = vadd.f32 %v308_v40, %v132_v37 }
 0x145   :  { %654 = vrot.lane.b32.xlu0 %v305_v41, %s3410_s26  ;;  %666 = vrot.lane.b32.xlu1 %v305_v41, %s3411_s2 }
 0x149   :  { %660 = vrot.lane.b32.xlu0 %v305_v41, %s3398_s19  ;;  %366 = vrot.lane.b32.xlu1 %v303_v36, %s3411_s2 }
 0x14d   :  { %656 = vrot.lane.b32.xlu0 %v3562_v42, %s3410_s26  ;;  %662 = vrot.lane.b32.xlu1 %v3562_v42, %s3398_s19 }
 0x151   :  { %668 = vrot.lane.b32.xlu0 %v3562_v42, %s3411_s2  ;;  %356 = vrot.lane.b32.xlu1 %v3568_v43, %s3410_s26 }
 0x155   :  { %362 = vrot.lane.b32.xlu0 %v3568_v43, %s3398_s19  ;;  %368 = vrot.lane.b32.xlu1 %v3568_v43, %s3411_s2 }
 0x1b3   :  { %v361_v46 = vpop.permute.xlu0 %360  ;;  %v355_v47 = vpop.permute.xlu1 %354 }
 0x1b4   :  { %v372_v57 = vcombine.low %v303_v36, %v361_v46  ;;  %v373_v58 = vcombine.high %v303_v36, %v361_v46 }
 0x1b6   :  { %v380_v9 = vrot.slane %v372_v57, %v3579_v56  ;;  %v387_v10 = vrot.slane %v373_v58, %v3579_v56 }
 0x1b7   :  { %v655_v51 = vpop.permute.xlu0 %654  ;;  %v667_v52 = vpop.permute.xlu1 %666 }
 0x1b8   :  { %v688_v54 = vcombine.low %v655_v51, %v667_v52  ;;  %v689_v55 = vcombine.high %v655_v51, %v667_v52 }
 0x1ba   :  { %v696_v3 = vrot.slane %v688_v54, %v3579_v56  ;;  %v703_v4 = vrot.slane %v689_v55, %v3579_v56 }
 0x1bb   :  { %v661_v59 = vpop.permute.xlu0 %660  ;;  %v367_v60 = vpop.permute.xlu1 %366 }
 0x1bc   :  { %v672_v61 = vcombine.low %v305_v41, %v661_v59  ;;  %v673_v62 = vcombine.high %v305_v41, %v661_v59  ;;  %v388_v63 = vcombine.low %v355_v47, %v367_v60  ;;  %v389_v1 = vcombine.high %v355_v47, %v367_v60 }
 0x1be   :  { %v680_v5 = vrot.slane %v672_v61, %v3579_v56  ;;  %v687_v6 = vrot.slane %v673_v62, %v3579_v56  ;;  %v396_v7 = vrot.slane %v388_v63, %v3579_v56  ;;  %v403_v8 = vrot.slane %v389_v1, %v3579_v56  ;;  %v3626_v61 = vpop.f32.mrb[0].mxu1 }
 0x1bf   :  { %v657_v11 = vpop.permute.xlu0 %656  ;;  %v663_v12 = vpop.permute.xlu1 %662 }
 0x1c0   :  { %v704_v13 = vcombine.low %v680_v5, %v696_v3  ;;  %v705_v14 = vcombine.high %v680_v5, %v696_v3  ;;  %v720_v15 = vcombine.low %v687_v6, %v703_v4  ;;  %v721_v16 = vcombine.high %v687_v6, %v703_v4  ;;  %v3039_v3 = vpop.f32.mrb[1].mxu1 }
 0x1c1   :  { %v404_v17 = vcombine.low %v380_v9, %v396_v7  ;;  %v405_v18 = vcombine.high %v380_v9, %v396_v7  ;;  %v420_v19 = vcombine.low %v387_v10, %v403_v8  ;;  %v421_v20 = vcombine.high %v387_v10, %v403_v8  ;;  %v3634_v8 = vpop.f32.mrb[2].mxu1 }
 0x1c2   :  { %v712_v22 = vrot.slane %v704_v13, %v3582_v2  ;;  %v719_v23 = vrot.slane %v705_v14, %v3582_v2  ;;  %v728_v24 = vrot.slane %v720_v15, %v3582_v2  ;;  %v735_v25 = vrot.slane %v721_v16, %v3582_v2  ;;  %v3040_v13 = vpop.f32.mrb[3].mxu1 }
 0x1c3   :  { %v412_v26 = vrot.slane %v404_v17, %v3582_v2  ;;  %v419_v27 = vrot.slane %v405_v18, %v3582_v2  ;;  %v428_v28 = vrot.slane %v420_v19, %v3582_v2  ;;  %v435_v29 = vrot.slane %v421_v20, %v3582_v2  ;;  %v669_v33 = vpop.permute.xlu0 %668  ;;  %v357_v35 = vpop.permute.xlu1 %356 }
 0x1c4   :  { %v808_v36 = vcombine.low %v712_v22, %v719_v23  ;;  %v2879_v37 = vcombine.high %v712_v22, %v719_v23  ;;  %v824_v38 = vcombine.low %v728_v24, %v735_v25  ;;  %v2880_v39 = vcombine.high %v728_v24, %v735_v25 }
 0x1c5   :  { %v508_v40 = vcombine.low %v412_v26, %v419_v27  ;;  %v2875_v41 = vcombine.high %v412_v26, %v419_v27  ;;  %v524_v44 = vcombine.low %v428_v28, %v435_v29  ;;  %v2876_v45 = vcombine.high %v428_v28, %v435_v29 }
 0x1c6   :  { %v3601_v46 = vrot.slane %v808_v36, %v3579_v56  ;;  %v3604_v47 = vrot.slane %v2879_v37, %v3579_v56  ;;  %v3607_v48 = vrot.slane %v824_v38, %v3579_v56  ;;  %v3610_v49 = vrot.slane %v2880_v39, %v3579_v56 }
 0x1c7   :  { %v740_v50 = vcombine.low %v3562_v42, %v663_v12  ;;  %v741_v51 = vcombine.high %v3562_v42, %v663_v12  ;;  %v756_v52 = vcombine.low %v657_v11, %v669_v33  ;;  %v757_v53 = vcombine.high %v657_v11, %v669_v33  ;;  %v363_v54 = vpop.permute.xlu0 %362  ;;  %v369_v55 = vpop.permute.xlu1 %368 }
 0x1c8   :  { %v3615_v57 = vrot.slane %v508_v40, %v3579_v56  ;;  %v3618_v58 = vrot.slane %v2875_v41, %v3579_v56  ;;  %v3621_v59 = vrot.slane %v524_v44, %v3579_v56  ;;  %v3624_v60 = vrot.slane %v2876_v45, %v3579_v56 }
 0x1c9   :  { %v748_v42 = vrot.slane %v740_v50, %v3579_v56  ;;  %v755_v62 = vrot.slane %v741_v51, %v3579_v56  ;;  %v764_v63 = vrot.slane %v756_v52, %v3579_v56  ;;  %v771_v1 = vrot.slane %v757_v53, %v3579_v56 }
 0x1ca   :  { %v440_v4 = vcombine.low %v3568_v43, %v363_v54  ;;  %v441_v5 = vcombine.high %v3568_v43, %v363_v54  ;;  %v456_v6 = vcombine.low %v357_v35, %v369_v55  ;;  %v457_v7 = vcombine.high %v357_v35, %v369_v55 }
 0x1cb   :  { %v772_v9 = vcombine.low %v748_v42, %v764_v63  ;;  %v773_v10 = vcombine.high %v748_v42, %v764_v63  ;;  %v788_v11 = vcombine.low %v755_v62, %v771_v1  ;;  %v789_v12 = vcombine.high %v755_v62, %v771_v1 }
 0x1cc   :  { %v448_v14 = vrot.slane %v440_v4, %v3579_v56  ;;  %v455_v15 = vrot.slane %v441_v5, %v3579_v56  ;;  %v464_v16 = vrot.slane %v456_v6, %v3579_v56  ;;  %v471_v17 = vrot.slane %v457_v7, %v3579_v56 }
 0x1cd   :  { %v780_v18 = vrot.slane %v772_v9, %v3582_v2  ;;  %v787_v43 = vrot.slane %v773_v10, %v3582_v2  ;;  %v796_v19 = vrot.slane %v788_v11, %v3582_v2  ;;  %v803_v20 = vrot.slane %v789_v12, %v3582_v2 }
 0x1ce   :  { %v472_v22 = vcombine.low %v448_v14, %v464_v16  ;;  %v473_v23 = vcombine.high %v448_v14, %v464_v16  ;;  %v488_v24 = vcombine.low %v455_v15, %v471_v17  ;;  %v489_v25 = vcombine.high %v455_v15, %v471_v17 }
 0x1cf   :  { %v876_v26 = vcombine.low %v780_v18, %v787_v43  ;;  %v2881_v27 = vcombine.high %v780_v18, %v787_v43  ;;  %v892_v28 = vcombine.low %v796_v19, %v803_v20  ;;  %v2882_v29 = vcombine.high %v796_v19, %v803_v20 }
 0x1d0   :  { %v480_v33 = vrot.slane %v472_v22, %v3582_v2  ;;  %v487_v35 = vrot.slane %v473_v23, %v3582_v2  ;;  %v496_v36 = vrot.slane %v488_v24, %v3582_v2  ;;  %v503_v37 = vrot.slane %v489_v25, %v3582_v2 }
 0x1d1   :  { %v540_v38 = vcombine.low %v3615_v57, %v3618_v58  ;;  %v541_v39 = vcombine.high %v3615_v57, %v3618_v58  ;;  %v556_v40 = vcombine.low %v3621_v59, %v3624_v60  ;;  %v557_v41 = vcombine.high %v3621_v59, %v3624_v60 }
 0x1d2   :  { %v576_v44 = vcombine.low %v480_v33, %v487_v35  ;;  %v2877_v45 = vcombine.high %v480_v33, %v487_v35  ;;  %v592_v50 = vcombine.low %v496_v36, %v503_v37  ;;  %v2878_v51 = vcombine.high %v496_v36, %v503_v37 }
 0x1d3   :  { %v840_v52 = vcombine.low %v3601_v46, %v3604_v47  ;;  %v856_v53 = vcombine.low %v3607_v48, %v3610_v49  ;;  %v841_v54 = vcombine.high %v3601_v46, %v3604_v47  ;;  %v857_v55 = vcombine.high %v3607_v48, %v3610_v49 }
 0x1d4   :  { %v3665_v57 = vrot.slane %v876_v26, %v3579_v56  ;;  %v3668_v58 = vrot.slane %v2881_v27, %v3579_v56  ;;  %v3671_v59 = vrot.slane %v892_v28, %v3579_v56  ;;  %v3674_v60 = vrot.slane %v2882_v29, %v3579_v56 }
 0x1d5   :  { %v848_v42 = vrot.slane %v840_v52, %v3582_v2  ;;  %v864_v62 = vrot.slane %v856_v53, %v3582_v2  ;;  %v855_v46 = vrot.slane %v841_v54, %v3582_v2  ;;  %v871_v47 = vrot.slane %v857_v55, %v3582_v2 }
 0x1d6   :  { %v3681_v48 = vrot.slane %v576_v44, %v3579_v56  ;;  %v3684_v49 = vrot.slane %v2877_v45, %v3579_v56  ;;  %v3687_v63 = vrot.slane %v592_v50, %v3579_v56  ;;  %v3690_v1 = vrot.slane %v2878_v51, %v3579_v56 }
 0x1d7   :  { %v872_v3 = vcombine.low %v848_v42, %v864_v62  ;;  %v874_v4 = vcombine.low %v855_v46, %v871_v47  ;;  %v548_v5 = vrot.slane %v540_v38, %v3582_v2  ;;  %v564_v6 = vrot.slane %v556_v40, %v3582_v2 }
 0x1d8   :  { %v908_v7 = vcombine.low %v3665_v57, %v3668_v58  ;;  %v924_v9 = vcombine.low %v3671_v59, %v3674_v60  ;;  %v555_v12 = vrot.slane %v541_v39, %v3582_v2  ;;  %v571_v13 = vrot.slane %v557_v41, %v3582_v2 }
 0x1d9   :  { %v944_v10 = vpack.c.bf16 %v872_v3, %v872_v3  ;;  %v948_v11 = vpack.c.bf16 %v874_v4, %v874_v4  ;;  %v135_v16 = vsub.s32 2, %v3541_v30  ;;  %v875_v43 = vcombine.high %v855_v46, %v871_v47  ;;  %v2932_v30 = vld [vmem:[%s4003_s8] ss:$0 sm:$0xff] }
 0x1da   :  { %v916_v14 = vrot.slane %v908_v7, %v3582_v2  ;;  %v932_v15 = vrot.slane %v924_v9, %v3582_v2  ;;  %v608_v19 = vcombine.low %v3681_v48, %v3684_v49  ;;  %v624_v22 = vcombine.low %v3687_v63, %v3690_v1 }
 0x1db   :  { %v1257_v17 = vsel %vm1252_vm1, %v944_v10, 0  ;;  %v1441_v18 = vsel %vm1252_vm1, %v948_v11, 0  ;;  %v572_v23 = vcombine.low %v548_v5, %v564_v6  ;;  %v574_v24 = vcombine.low %v555_v12, %v571_v13 }
 0x1dc   :  { %3042 = vmatpush3.bf16.xpose.msra.mxu1 %v1257_v17  ;;  %3066 = vmatpush3.bf16.xpose.msra.mxu0 %v1441_v18  ;;  %v940_v20 = vcombine.low %v916_v14, %v932_v15  ;;  %v136_v26 = vrot.slane %v3547_v32, %v135_v16  ;;  %v950_v27 = vpack.c.bf16 %v875_v43, %v875_v43 }
 0x1dd   :  { %3047 = vmatprep.subr.bf16.mxu1 %v3408_v21  ;;  %3077 = vmatprep.subr.bf16.mxu0 %v3408_v21  ;;  %v616_v28 = vrot.slane %v608_v19, %v3582_v2  ;;  %v644_v29 = vpack.c.bf16 %v572_v23, %v572_v23  ;;  %v648_v33 = vpack.c.bf16 %v574_v24, %v574_v24 }
 0x1de   :  { %v945_v25 = vpack.c.bf16 %v940_v20, %v940_v20  ;;  %v632_v36 = vrot.slane %v624_v22, %v3582_v2  ;;  %v3716_v37 = vadd.f32 %v3626_v61, %v136_v26  ;;  %v3719_v38 = vadd.f32 %v3634_v8, %v136_v26 }
 0x1df   :  { %v1533_v32 = vsel %vm1252_vm1, %v950_v27, 0  ;;  %v873_v39 = vcombine.high %v848_v42, %v864_v62  ;;  %v575_v40 = vcombine.high %v555_v12, %v571_v13  ;;  %v941_v50 = vcombine.high %v916_v14, %v932_v15 }
 0x1e0   :  { %v1303_v35 = vsel %vm1252_vm1, %v945_v25, 0  ;;  %v640_v61 = vcombine.low %v616_v28, %v632_v36  ;;  %954 = vrot.lane.b32.xlu1 %v3716_v37, %s3410_s26  ;;  %v909_v51 = vcombine.high %v3665_v57, %v3668_v58  ;;  %v925_v52 = vcombine.high %v3671_v59, %v3674_v60 }
 0x1e1   :  { %v946_v8 = vpack.c.bf16 %v873_v39, %v873_v39  ;;  %v650_v44 = vpack.c.bf16 %v575_v40, %v575_v40  ;;  %v573_v53 = vcombine.high %v548_v5, %v564_v6  ;;  %v947_v54 = vpack.c.bf16 %v941_v50, %v941_v50 }
 0x1e2   :  { %v645_v41 = vpack.c.bf16 %v640_v61, %v640_v61  ;;  %v923_v55 = vrot.slane %v909_v51, %v3582_v2  ;;  %v939_v42 = vrot.slane %v925_v52, %v3582_v2  ;;  %v609_v59 = vcombine.high %v3681_v48, %v3684_v49 }
 0x1e3   :  { %3044 = vmatmul.mubr.msk.bf16.vlgmr.msra.gmra.mrb[4].mxu1 %vm1252_vm1, %v644_v29  ;;  %3068 = vmatmul.mubr.msk.bf16.vlgmr.msra.gmra.mrb[4].mxu0 %vm1252_vm1, %v648_v33  ;;  %v1349_v45 = vsel %vm1252_vm1, %v946_v8, 0  ;;  %v646_v62 = vpack.c.bf16 %v573_v53, %v573_v53  ;;  %v1395_v57 = vsel %vm1252_vm1, %v947_v54, 0  ;;  %v625_v60 = vcombine.high %v3687_v63, %v3690_v1 }
 0x1e4   :  { %3048 = vmatpush3.bf16.xpose.msra.mxu1 %v1303_v35  ;;  %3078 = vmatpush3.bf16.xpose.msra.mxu0 %v1533_v32  ;;  %v942_v58 = vcombine.low %v923_v55, %v939_v42  ;;  %v641_v46 = vcombine.high %v616_v28, %v632_v36  ;;  %v623_v4 = vrot.slane %v609_v59, %v3582_v2 }
 0x1e5   :  { %3049 = vmatprep.mubr.msk.bf16.mxu1 %vm3409_vm0, %v3408_v21  ;;  %3079 = vmatprep.mubr.msk.bf16.mxu0 %vm3409_vm0, %v3408_v21  ;;  %v639_v5 = vrot.slane %v625_v60, %v3582_v2  ;;  %v943_v7 = vcombine.high %v923_v55, %v939_v42 }
 0x1e6   :  { %3053 = vmatprep.subr.bf16.mxu1 %v3408_v21  ;;  %3089 = vmatprep.subr.bf16.mxu0 %v3408_v21  ;;  %v949_v47 = vpack.c.bf16 %v942_v58, %v942_v58  ;;  %v647_v3 = vpack.c.bf16 %v641_v46, %v641_v46 }
 0x1e7   :  { %v642_v48 = vcombine.low %v623_v4, %v639_v5  ;;  %v951_v49 = vpack.c.bf16 %v943_v7, %v943_v7  ;;  %v643_v9 = vcombine.high %v623_v4, %v639_v5 }
 0x1e8   :  { %v1487_v6 = vsel %vm1252_vm1, %v949_v47, 0 }
 0x1e9   :  { %v649_v63 = vpack.c.bf16 %v642_v48, %v642_v48  ;;  %v1579_v1 = vsel %vm1252_vm1, %v951_v49, 0  ;;  %v651_v10 = vpack.c.bf16 %v643_v9, %v643_v9 }
 0x1eb   :  { %3050 = vmatmul.mubr.msk.bf16.vlgmr.msra.gmra.mrb[8].mxu1 %vm1252_vm1, %v645_v41  ;;  %3080 = vmatmul.mubr.msk.bf16.vlgmr.msra.gmra.mrb[8].mxu0 %vm1252_vm1, %v650_v44 }
 0x1ec   :  { %3054 = vmatpush3.bf16.xpose.msra.mxu1 %v1349_v45  ;;  %3055 = vmatprep.mubr.msk.bf16.mxu1 %vm3409_vm0, %v3408_v21 }
 0x1ed   :  { %3059 = vmatprep.subr.bf16.mxu1 %v3408_v21  ;;  %3091 = vmatprep.mubr.msk.bf16.mxu0 %vm3409_vm0, %v3408_v21 }
 0x1f3   :  { %3056 = vmatmul.mubr.msk.bf16.vlgmr.msra.gmra.mrb[12].mxu1 %vm1252_vm1, %v646_v62 }
 0x1f4   :  { %3060 = vmatpush3.bf16.xpose.msra.mxu1 %v1395_v57  ;;  %3061 = vmatprep.mubr.msk.bf16.mxu1 %vm3409_vm0, %v3408_v21 }
 0x1f5   :  { %3071 = vmatprep.subr.bf16.mxu1 %v3408_v21 }
 0x1fb   :  { %3062 = vmatmul.mubr.msk.bf16.vlgmr.msra.gmra.mrb[16].mxu1 %vm1252_vm1, %v647_v3 }
 0x1fc   :  { %3072 = vmatpush3.bf16.xpose.msra.mxu1 %v1487_v6  ;;  %3073 = vmatprep.mubr.msk.bf16.mxu1 %vm3409_vm0, %v3408_v21 }
 0x1fd   :  { %3083 = vmatprep.subr.bf16.mxu1 %v3408_v21 }
 0x203   :  { %3074 = vmatmul.mubr.msk.bf16.vlgmr.msra.gmra.mrb[20].mxu1 %vm1252_vm1, %v649_v63 }
 0x204   :  { %3084 = vmatpush3.bf16.xpose.msra.mxu1 %v1579_v1  ;;  %3085 = vmatprep.mubr.msk.bf16.mxu1 %vm3409_vm0, %v3408_v21 }
 0x205   :  { %3095 = vmatprep.subr.bf16.mxu1 %v3408_v21 }
 0x20b   :  { %3086 = vmatmul.mubr.msk.bf16.vlgmr.msra.gmra.mrb[24].mxu1 %vm1252_vm1, %v651_v10 }
 0x20c   :  { %3097 = vmatprep.mubr.msk.bf16.mxu1 %vm3409_vm0, %v3408_v21 }
 0x252   :  { %v3787_v59 = vpop.permute.xlu1 %954 }
 0x2b6   :  { %v1293_v11 = vpop.f32.mrb[4].mxu1  ;;  %v3770_v12 = vpop.f32.mrb[4].mxu0 }
 0x2b7   :  { %v3045_v13 = vpop.f32.mrb[5].mxu1  ;;  %v3069_v14 = vpop.f32.mrb[5].mxu0  ;;  %v1634_v15 = vsel %vm1621_vm2, %v3770_v12, -inf  ;;  %v1622_v16 = vsel %vm1621_vm2, %v1293_v11, -inf }
 0x2b8   :  { %1635 = vmax.xlane.f32.xlu1 %v1634_v15  ;;  %v1480_v17 = vpop.f32.mrb[6].mxu0  ;;  %1623 = vmax.xlane.f32.xlu0 %v1622_v16  ;;  %v1296_v18 = vpop.f32.mrb[6].mxu1 }
 0x2b9   :  { %v3046_v43 = vpop.f32.mrb[7].mxu1  ;;  %v3070_v19 = vpop.f32.mrb[7].mxu0 }
 0x2be   :  { %v1339_v20 = vpop.f32.mrb[8].mxu1  ;;  %v1569_v22 = vpop.f32.mrb[8].mxu0 }
 0x2bf   :  { %v3051_v23 = vpop.f32.mrb[9].mxu1  ;;  %v3081_v24 = vpop.f32.mrb[9].mxu0  ;;  %v1625_v25 = vsel %vm1621_vm2, %v1339_v20, -inf  ;;  %v1640_v33 = vsel %vm1621_vm2, %v1569_v22, -inf }
 0x2c0   :  { %v1572_v26 = vpop.f32.mrb[10].mxu0  ;;  %1626 = vmax.xlane.f32.xlu1 %v1625_v25  ;;  %v1342_v27 = vpop.f32.mrb[10].mxu1 }
 0x2c1   :  { %v3052_v28 = vpop.f32.mrb[11].mxu1  ;;  %v3082_v29 = vpop.f32.mrb[11].mxu0 }
 0x2c4   :  { %1641 = vmax.xlane.f32.xlu1 %v1640_v33 }
 0x2c6   :  { %v1385_v35 = vpop.f32.mrb[12].mxu1 }
 0x2c7   :  { %v3057_v36 = vpop.f32.mrb[13].mxu1  ;;  %v1628_v32 = vsel %vm1621_vm2, %v1385_v35, -inf }
 0x2c8   :  { %1629 = vmax.xlane.f32.xlu0 %v1628_v32  ;;  %v1388_v39 = vpop.f32.mrb[14].mxu1 }
 0x2c9   :  { %v3058_v61 = vpop.f32.mrb[15].mxu1 }
 0x2ce   :  { %v1431_v40 = vpop.f32.mrb[16].mxu1 }
 0x2cf   :  { %v3063_v8 = vpop.f32.mrb[17].mxu1  ;;  %v1631_v41 = vsel %vm1621_vm2, %v1431_v40, -inf }
 0x2d0   :  { %1632 = vmax.xlane.f32.xlu0 %v1631_v41  ;;  %v1434_v44 = vpop.f32.mrb[18].mxu1 }
 0x2d1   :  { %v3064_v45 = vpop.f32.mrb[19].mxu1 }
 0x2d5   :  { %960 = vrot.lane.b32.xlu1 %v3716_v37, %s3398_s19 }
 0x2d6   :  { %v1523_v50 = vpop.f32.mrb[20].mxu1 }
 0x2d7   :  { %v3075_v51 = vpop.f32.mrb[21].mxu1  ;;  %v1637_v52 = vsel %vm1621_vm2, %v1523_v50, -inf }
 0x2d8   :  { %1638 = vmax.xlane.f32.xlu0 %v1637_v52  ;;  %v1526_v53 = vpop.f32.mrb[22].mxu1 }
 0x2d9   :  { %962 = vrot.lane.b32.xlu1 %v3719_v38, %s3398_s19  ;;  %v3076_v54 = vpop.f32.mrb[23].mxu1 }
 0x2de   :  { %v1615_v55 = vpop.f32.mrb[24].mxu1 }
 0x2df   :  { %v3087_v42 = vpop.f32.mrb[25].mxu1  ;;  %v1643_v62 = vsel %vm1621_vm2, %v1615_v55, -inf }
 0x2e0   :  { %1644 = vmax.xlane.f32.xlu0 %v1643_v62  ;;  %v1618_v57 = vpop.f32.mrb[26].mxu1 }
 0x2e1   :  { %v3088_v58 = vpop.f32.mrb[27].mxu1 }
 0x2f6   :  { %956 = vrot.lane.b32.xlu0 %v3719_v38, %s3410_s26 }
 0x345   :  { %v1624_v60 = vpop.xlane.xlu0 %1623  ;;  %v1636_v3 = vpop.xlane.xlu1 %1635 }
 0x346   :  { %v1646_v46 = vsub.f32 %v1293_v11, %v1624_v60  ;;  %v1650_v17 = vsub.f32 %v3770_v12, %v1636_v3 }
 0x348   :  { %v1654_v47 = vmul.f32 1.442695, %v1646_v46  ;;  %v1662_v19 = vmul.f32 1.442695, %v1650_v17 }
 0x34a   :  { %3269 = vpow2.f32 %v1654_v47 }
 0x34d   :  { %v1627_v4 = vpop.xlane.xlu1 %1626 }
 0x34e   :  { %v1647_v5 = vsub.f32 %v1339_v20, %v1627_v4 }
 0x350   :  { %v1656_v6 = vmul.f32 1.442695, %v1647_v5 }
 0x351   :  { %v1642_v11 = vpop.xlane.xlu1 %1641 }
 0x352   :  { %3271 = vpow2.f32 %v1656_v6  ;;  %v1652_v13 = vsub.f32 %v1569_v22, %v1642_v11 }
 0x354   :  { %v3789_v7 = vpop.eup %3269  ;;  %v1666_v15 = vmul.f32 1.442695, %v1652_v13 }
 0x355   :  { %v1670_v48 = vsel %vm1621_vm2, %v3789_v7, 0.0  ;;  %v1630_v1 = vpop.xlane.xlu0 %1629  ;;  %v961_v8 = vpop.permute.xlu1 %960 }
 0x356   :  { %1671 = vadd.xlane.f32.xlu1 %v1670_v48  ;;  %v1648_v16 = vsub.f32 %v1385_v35, %v1630_v1  ;;  %v972_v48 = vcombine.low %v3716_v37, %v961_v8 }
 0x358   :  { %v1658_v18 = vmul.f32 1.442695, %v1648_v16 }
 0x359   :  { %v963_v41 = vpop.permute.xlu1 %962 }
 0x35a   :  { %v1040_v45 = vcombine.low %v3719_v38, %v963_v41 }
 0x35c   :  { %v3793_v49 = vpop.eup %3271 }
 0x35d   :  { %v1673_v63 = vsel %vm1621_vm2, %v3793_v49, 0.0  ;;  %v1633_v9 = vpop.xlane.xlu0 %1632 }
 0x35e   :  { %1674 = vadd.xlane.f32.xlu0 %v1673_v63  ;;  %v1649_v10 = vsub.f32 %v1431_v40, %v1633_v9  ;;  %v973_v63 = vcombine.high %v3716_v37, %v961_v8 }
 0x360   :  { %v1660_v14 = vmul.f32 1.442695, %v1649_v10 }
 0x362   :  { %3273 = vpow2.f32 %v1660_v14 }
 0x363   :  { %3275 = vpow2.f32 %v1666_v15 }
 0x364   :  { %3277 = vpow2.f32 %v1658_v18 }
 0x365   :  { %v1639_v43 = vpop.xlane.xlu0 %1638  ;;  %3279 = vpow2.f32 %v1662_v19  ;;  %v987_v19 = vrot.slane %v973_v63, %v3579_v56 }
 0x366   :  { %v1651_v20 = vsub.f32 %v1523_v50, %v1639_v43  ;;  %v1041_v50 = vcombine.high %v3719_v38, %v963_v41  ;;  %v980_v43 = vrot.slane %v972_v48, %v3579_v56 }
 0x367   :  { %968 = vrot.lane.b32.xlu1 %v3719_v38, %s3411_s2 }
 0x368   :  { %v1664_v25 = vmul.f32 1.442695, %v1651_v20  ;;  %v1055_v42 = vrot.slane %v1041_v50, %v3579_v56 }
 0x36a   :  { %3281 = vpow2.f32 %v1664_v25 }
 0x36c   :  { %v3802_v24 = vpop.eup %3273 }
 0x36d   :  { %v1645_v23 = vpop.xlane.xlu0 %1644  ;;  %v1679_v22 = vsel %vm1621_vm2, %v3802_v24, 0.0  ;;  %v3806_v27 = vpop.eup %3275 }
 0x36e   :  { %v1653_v26 = vsub.f32 %v1615_v55, %v1645_v23  ;;  %v1688_v28 = vsel %vm1621_vm2, %v3806_v27, 0.0  ;;  %v3810_v29 = vpop.eup %3277  ;;  %v1048_v55 = vrot.slane %v1040_v45, %v3579_v56 }
 0x36f   :  { %v1676_v33 = vsel %vm1621_vm2, %v3810_v29, 0.0  ;;  %v3814_v35 = vpop.eup %3279 }
 0x370   :  { %v1668_v12 = vmul.f32 1.442695, %v1653_v26  ;;  %v1682_v36 = vsel %vm1621_vm2, %v3814_v35, 0.0 }
 0x371   :  { %v957_v51 = vpop.permute.xlu0 %956 }
 0x372   :  { %3283 = vpow2.f32 %v1668_v12 }
 0x374   :  { %966 = vrot.lane.b32.xlu0 %v3716_v37, %s3411_s2  ;;  %v3818_v32 = vpop.eup %3281 }
 0x375   :  { %v1685_v39 = vsel %vm1621_vm2, %v3818_v32, 0.0 }
 0x37c   :  { %v3822_v61 = vpop.eup %3283 }
 0x37d   :  { %v1691_v40 = vsel %vm1621_vm2, %v3822_v61, 0.0 }
 0x38b   :  { %1680 = vadd.xlane.f32.xlu1 %v1679_v22 }
 0x38f   :  { %1689 = vadd.xlane.f32.xlu1 %v1688_v28 }
 0x393   :  { %1677 = vadd.xlane.f32.xlu0 %v1676_v33 }
 0x397   :  { %1683 = vadd.xlane.f32.xlu0 %v1682_v36 }
 0x39b   :  { %1686 = vadd.xlane.f32.xlu0 %v1685_v39 }
 0x39f   :  { %1692 = vadd.xlane.f32.xlu0 %v1691_v40 }
 0x3e3   :  { %v1672_v44 = vpop.xlane.xlu1 %1671 }
 0x3e7   :  { %v969_v52 = vpop.permute.xlu1 %968 }
 0x3e8   :  { %v1056_v53 = vcombine.low %v957_v51, %v969_v52  ;;  %v1057_v54 = vcombine.high %v957_v51, %v969_v52 }
 0x3ea   :  { %v1064_v62 = vrot.slane %v1056_v53, %v3579_v56  ;;  %v1071_v57 = vrot.slane %v1057_v54, %v3579_v56 }
 0x3eb   :  { %v1675_v58 = vpop.xlane.xlu0 %1674 }
 0x3ec   :  { %v1072_v60 = vcombine.low %v1048_v55, %v1064_v62  ;;  %v1073_v46 = vcombine.high %v1048_v55, %v1064_v62  ;;  %v1088_v47 = vcombine.low %v1055_v42, %v1071_v57  ;;  %v1089_v3 = vcombine.high %v1055_v42, %v1071_v57 }
 0x3ed   :  { %3285 = vrcp.f32 %v1675_v58 }
 0x3ee   :  { %v1080_v38 = vrot.slane %v1072_v60, %v3582_v2  ;;  %v1087_v4 = vrot.slane %v1073_v46, %v3582_v2  ;;  %v1096_v5 = vrot.slane %v1088_v47, %v3582_v2  ;;  %v1103_v6 = vrot.slane %v1089_v3, %v3582_v2 }
 0x3ef   :  { %v967_v1 = vpop.permute.xlu0 %966  ;;  %3287 = vrcp.f32 %v1672_v44 }
 0x3f0   :  { %v1176_v9 = vcombine.low %v1080_v38, %v1087_v4  ;;  %v2885_v10 = vcombine.high %v1080_v38, %v1087_v4  ;;  %v1192_v11 = vcombine.low %v1096_v5, %v1103_v6  ;;  %v2886_v13 = vcombine.high %v1096_v5, %v1103_v6 }
 0x3f1   :  { %v988_v14 = vcombine.low %v3787_v59, %v967_v1  ;;  %v989_v15 = vcombine.high %v3787_v59, %v967_v1 }
 0x3f2   :  { %v3841_v16 = vrot.slane %v1176_v9, %v3579_v56  ;;  %v3844_v17 = vrot.slane %v2885_v10, %v3579_v56  ;;  %v3847_v18 = vrot.slane %v1192_v11, %v3579_v56  ;;  %v3850_v37 = vrot.slane %v2886_v13, %v3579_v56 }
 0x3f3   :  { %v996_v20 = vrot.slane %v988_v14, %v3579_v56  ;;  %v1003_v59 = vrot.slane %v989_v15, %v3579_v56 }
 0x3f4   :  { %v1208_v23 = vcombine.low %v3841_v16, %v3844_v17  ;;  %v1224_v25 = vcombine.low %v3847_v18, %v3850_v37 }
 0x3f5   :  { %v1004_v26 = vcombine.low %v980_v43, %v996_v20  ;;  %v1005_v22 = vcombine.high %v980_v43, %v996_v20  ;;  %v1020_v12 = vcombine.low %v987_v19, %v1003_v59  ;;  %v1021_v28 = vcombine.high %v987_v19, %v1003_v59 }
 0x3f6   :  { %v1216_v33 = vrot.slane %v1208_v23, %v3582_v2  ;;  %v1232_v36 = vrot.slane %v1224_v25, %v3582_v2  ;;  %v1225_v19 = vcombine.high %v3847_v18, %v3850_v37 }
 0x3f7   :  { %v3286_v39 = vpop.eup %3285  ;;  %v1012_v40 = vrot.slane %v1004_v26, %v3582_v2  ;;  %v1019_v8 = vrot.slane %v1005_v22, %v3582_v2  ;;  %v1028_v41 = vrot.slane %v1020_v12, %v3582_v2  ;;  %v1035_v45 = vrot.slane %v1021_v28, %v3582_v2 }
 0x3f8   :  { %v1240_v50 = vcombine.low %v1216_v33, %v1232_v36  ;;  %v1241_v51 = vcombine.high %v1216_v33, %v1232_v36  ;;  %v1697_v55 = vmul.f32 %v3286_v39, %v3793_v49  ;;  %v1239_v59 = vrot.slane %v1225_v19, %v3582_v2 }
 0x3f9   :  { %v1108_v52 = vcombine.low %v1012_v40, %v1019_v8  ;;  %v2883_v53 = vcombine.high %v1012_v40, %v1019_v8  ;;  %v1124_v54 = vcombine.low %v1028_v41, %v1035_v45  ;;  %v2884_v44 = vcombine.high %v1028_v41, %v1035_v45  ;;  %v3288_v6 = vpop.eup %3287 }
 0x3fa   :  { %v1245_v42 = vpack.c.bf16 %v1240_v50, %v1240_v50  ;;  %v1247_v47 = vpack.c.bf16 %v1241_v51, %v1241_v51  ;;  %v1711_v4 = vpack.c.bf16 %v1697_v55, %v1697_v55  ;;  %v1695_v9 = vmul.f32 %v3288_v6, %v3789_v7  ;;  %v3224_v6 = vld [vmem:[#allocation4 + $0x18] sm:$0xff]  }
 0x3fb   :  { %v1115_v62 = vrot.slane %v1108_v52, %v3579_v56  ;;  %v1123_v57 = vrot.slane %v2883_v53, %v3579_v56  ;;  %v1131_v58 = vrot.slane %v1124_v54, %v3579_v56  ;;  %v1139_v60 = vrot.slane %v2884_v44, %v3579_v56 }
 0x3fc   :  { %v1769_v46 = vsel %vm1721_vm3, %v1245_v42, 0  ;;  %v1861_v48 = vsel %vm1721_vm3, %v1247_v47, 0  ;;  %v1710_v14 = vpack.c.bf16 %v1695_v9, %v1695_v9  ;;  %v1209_v7 = vcombine.high %v3841_v16, %v3844_v17 }
 0x3fd   :  { %3096 = vmatpush3.bf16.msra.mxu1 %v1769_v46  ;;  %v1140_v3 = vcombine.low %v1115_v62, %v1123_v57  ;;  %v1156_v38 = vcombine.low %v1131_v58, %v1139_v60  ;;  %v1141_v26 = vcombine.high %v1115_v62, %v1123_v57  ;;  %v1157_v22 = vcombine.high %v1131_v58, %v1139_v60 }
 0x3fe   :  { %3107 = vmatprep.subr.bf16.mxu1 %v3408_v21  ;;  %v1223_v20 = vrot.slane %v1209_v7, %v3582_v2 }
 0x3ff   :  { %v1148_v49 = vrot.slane %v1140_v3, %v3582_v2  ;;  %v1164_v5 = vrot.slane %v1156_v38, %v3582_v2  ;;  %v1155_v16 = vrot.slane %v1141_v26, %v3582_v2  ;;  %v1171_v17 = vrot.slane %v1157_v22, %v3582_v2 }
 0x400   :  { %3098 = vmatmul.mubr.msk.bf16.vlgmr.msra.gmra.mrb[28].mxu1 %vm1621_vm2, %v1711_v4  ;;  %v1242_v25 = vcombine.low %v1223_v20, %v1239_v59  ;;  %v1243_v44 = vcombine.high %v1223_v20, %v1239_v59 }
 0x401   :  { %3108 = vmatpush3.bf16.msra.mxu1 %v1861_v48  ;;  %v1172_v63 = vcombine.low %v1148_v49, %v1164_v5  ;;  %v1173_v1 = vcombine.high %v1148_v49, %v1164_v5  ;;  %3109 = vmatprep.mubr.msk.bf16.mxu1 %vm3409_vm0, %v3408_v21  ;;  %v1174_v40 = vcombine.low %v1155_v16, %v1171_v17  ;;  %v3223_v5 = vld [vmem:[#allocation4 + $0x10] sm:$0xff]   ;;  %v3225_v48 = vld [vmem:[#allocation4 + $0x20] sm:$0xff]  }
 0x402   :  { %3119 = vmatprep.subr.bf16.mxu1 %v3408_v21  ;;  %v1249_v36 = vpack.c.bf16 %v1242_v25, %v1242_v25  ;;  %v1175_v54 = vcombine.high %v1155_v16, %v1171_v17  ;;  %v1251_v57 = vpack.c.bf16 %v1243_v44, %v1243_v44 }
 0x403   :  { %v1244_v10 = vpack.c.bf16 %v1172_v63, %v1172_v63  ;;  %v1246_v13 = vpack.c.bf16 %v1173_v1, %v1173_v1  ;;  %v1248_v50 = vpack.c.bf16 %v1174_v40, %v1174_v40  ;;  %v3226_v63 = vld [vmem:[#allocation4 + $0x28] sm:$0xff]  }
 0x404   :  { %v1953_v39 = vsel %vm1721_vm3, %v1249_v36, 0  ;;  %v1250_v62 = vpack.c.bf16 %v1175_v54, %v1175_v54  ;;  %v2045_v38 = vsel %vm1721_vm3, %v1251_v57, 0 }
 0x405   :  { %v1723_v11 = vsel %vm1721_vm3, %v1244_v10, 0  ;;  %v1815_v15 = vsel %vm1721_vm3, %v1246_v13, 0  ;;  %v1907_v53 = vsel %vm1721_vm3, %v1248_v50, 0 }
 0x406   :  { %3090 = vmatpush3.bf16.msra.mxu0 %v1723_v11  ;;  %v1999_v3 = vsel %vm1721_vm3, %v1250_v62, 0 }
 0x407   :  { %3101 = vmatprep.subr.bf16.mxu0 %v3408_v21 }
 0x409   :  { %3092 = vmatmul.mubr.msk.bf16.vlgmr.msra.gmra.mrb[12].mxu0 %vm1621_vm2, %v1710_v14 }
 0x40a   :  { %3102 = vmatpush3.bf16.msra.mxu0 %v1815_v15  ;;  %3103 = vmatprep.mubr.msk.bf16.mxu0 %vm3409_vm0, %v3408_v21 }
 0x40b   :  { %3113 = vmatprep.subr.bf16.mxu0 %v3408_v21 }
 0x418   :  { %v1681_v43 = vpop.xlane.xlu1 %1680 }
 0x419   :  { %3289 = vrcp.f32 %v1681_v43 }
 0x41c   :  { %v1690_v8 = vpop.xlane.xlu1 %1689 }
 0x420   :  { %v1678_v23 = vpop.xlane.xlu0 %1677 }
 0x421   :  { %3291 = vrcp.f32 %v1678_v23 }
 0x423   :  { %v3290_v12 = vpop.eup %3289 }
 0x424   :  { %v1701_v28 = vmul.f32 %v3290_v12, %v3802_v24  ;;  %v1684_v33 = vpop.xlane.xlu0 %1683 }
 0x425   :  { %3293 = vrcp.f32 %v1684_v33 }
 0x426   :  { %v1713_v18 = vpack.c.bf16 %v1701_v28, %v1701_v28 }
 0x428   :  { %v1687_v37 = vpop.xlane.xlu0 %1686  ;;  %3110 = vmatmul.mubr.msk.bf16.vlgmr.msra.gmra.mrb[32].mxu1 %vm1621_vm2, %v1713_v18 }
 0x429   :  { %3295 = vrcp.f32 %v1687_v37  ;;  %3120 = vmatpush3.bf16.msra.mxu1 %v1953_v39  ;;  %3121 = vmatprep.mubr.msk.bf16.mxu1 %vm3409_vm0, %v3408_v21 }
 0x42a   :  { %3131 = vmatprep.subr.bf16.mxu1 %v3408_v21  ;;  %3297 = vrcp.f32 %v1690_v8 }
 0x42b   :  { %v3292_v24 = vpop.eup %3291 }
 0x42c   :  { %v1699_v41 = vmul.f32 %v3292_v24, %v3810_v29  ;;  %v1693_v45 = vpop.xlane.xlu0 %1692 }
 0x42d   :  { %3299 = vrcp.f32 %v1693_v45 }
 0x42e   :  { %v1712_v51 = vpack.c.bf16 %v1699_v41, %v1699_v41 }
 0x42f   :  { %v3294_v52 = vpop.eup %3293 }
 0x430   :  { %3104 = vmatmul.mubr.msk.bf16.vlgmr.msra.gmra.mrb[16].mxu0 %vm1621_vm2, %v1712_v51  ;;  %v1703_v55 = vmul.f32 %v3294_v52, %v3814_v35 }
 0x431   :  { %3114 = vmatpush3.bf16.msra.mxu0 %v1907_v53  ;;  %3115 = vmatprep.mubr.msk.bf16.mxu0 %vm3409_vm0, %v3408_v21 }
 0x432   :  { %3125 = vmatprep.subr.bf16.mxu0 %v3408_v21  ;;  %v1714_v60 = vpack.c.bf16 %v1703_v55, %v1703_v55 }
 0x433   :  { %v3296_v29 = vpop.eup %3295 }
 0x434   :  { %v1705_v42 = vmul.f32 %v3296_v29, %v3818_v32  ;;  %v3298_v58 = vpop.eup %3297 }
 0x435   :  { %v1707_v35 = vmul.f32 %v3298_v58, %v3806_v27  ;;  %v3221_v27 = vld [vmem:[#allocation4] sm:$0xff]  }
 0x436   :  { %v1715_v46 = vpack.c.bf16 %v1705_v42, %v1705_v42 }
 0x437   :  { %v3300_v47 = vpop.eup %3299  ;;  %v1716_v4 = vpack.c.bf16 %v1707_v35, %v1707_v35 }
 0x438   :  { %3116 = vmatmul.mubr.msk.bf16.vlgmr.msra.gmra.mrb[20].mxu0 %vm1621_vm2, %v1714_v60  ;;  %3122 = vmatmul.mubr.msk.bf16.vlgmr.msra.gmra.mrb[36].mxu1 %vm1621_vm2, %v1715_v46  ;;  %v1709_v32 = vmul.f32 %v3300_v47, %v3822_v61  ;;  %v3222_v61 = vld [vmem:[#allocation4 + $0x8] sm:$0xff]  }
 0x439   :  { %3126 = vmatpush3.bf16.msra.mxu0 %v1999_v3  ;;  %3132 = vmatpush3.bf16.msra.mxu1 %v2045_v38 }
 0x43a   :  { %3127 = vmatprep.mubr.msk.bf16.mxu0 %vm3409_vm0, %v3408_v21  ;;  %3133 = vmatprep.mubr.msk.bf16.mxu1 %vm3409_vm0, %v3408_v21  ;;  %v1717_v49 = vpack.c.bf16 %v1709_v32, %v1709_v32 }
 0x43b   :  { %3137 = vmatprep.subr.bf16.mxu0 %v3408_v21 }
 0x440   :  { %3128 = vmatmul.mubr.msk.bf16.vlgmr.msra.gmra.mrb[24].mxu0 %vm1621_vm2, %v1716_v4  ;;  %3134 = vmatmul.mubr.msk.bf16.vlgmr.msra.gmra.mrb[40].mxu1 %vm1621_vm2, %v1717_v49 }
 0x441   :  { %3153 = vmatprep.mubr.msk.bf16.mxu0 %vm3409_vm0, %v3408_v21  ;;  %2647 = vmatprep.mubr.bf16.mxu1 %v3407_v0 }
 0x442   :  { %3138 = vmatpush3.bf16.msra.mxu0 %v3221_v27 }
 0x443   :  { %3139 = vmatprep.subr.bf16.mxu0 %v3408_v21 }
 0x446   :  { %3140 = vmatpush3.bf16.msra.mxu0 %v3222_v61 }
 0x447   :  { %3141 = vmatprep.subr.bf16.mxu0 %v3408_v21 }
 0x44a   :  { %3142 = vmatpush3.bf16.msra.mxu0 %v3223_v5 }
 0x44b   :  { %3143 = vmatprep.subr.bf16.mxu0 %v3408_v21 }
 0x44e   :  { %3144 = vmatpush3.bf16.msra.mxu0 %v3224_v6 }
 0x44f   :  { %3145 = vmatprep.subr.bf16.mxu0 %v3408_v21 }
 0x452   :  { %3146 = vmatpush3.bf16.msra.mxu0 %v3225_v48 }
 0x453   :  { %3147 = vmatprep.subr.bf16.mxu0 %v3408_v21 }
 0x456   :  { %3148 = vmatpush3.bf16.msra.mxu0 %v3226_v63 }
 0x457   :  { %3149 = vmatprep.subr.bf16.mxu0 %v3408_v21 }
 0x4d3   :  { %v1805_v0 = vpop.f32.mrb[28].mxu1 }
 0x4d4   :  { %v3099_v1 = vpop.f32.mrb[29].mxu1 }
 0x4d5   :  { %v1808_v9 = vpop.f32.mrb[30].mxu1 }
 0x4d6   :  { %v3100_v10 = vpop.f32.mrb[31].mxu1 }
 0x4dc   :  { %v1759_v11 = vpop.f32.mrb[12].mxu0 }
 0x4dd   :  { %v3093_v13 = vpop.f32.mrb[13].mxu0 }
 0x4de   :  { %v1762_v14 = vpop.f32.mrb[14].mxu0 }
 0x4df   :  { %v3094_v15 = vpop.f32.mrb[15].mxu0 }
 0x4fb   :  { %v1897_v43 = vpop.f32.mrb[32].mxu1 }
 0x4fc   :  { %v3111_v7 = vpop.f32.mrb[33].mxu1 }
 0x4fd   :  { %v1900_v19 = vpop.f32.mrb[34].mxu1 }
 0x4fe   :  { %v3112_v20 = vpop.f32.mrb[35].mxu1 }
 0x503   :  { %v1851_v59 = vpop.f32.mrb[16].mxu0 }
 0x504   :  { %v3105_v23 = vpop.f32.mrb[17].mxu0 }
 0x505   :  { %v1854_v25 = vpop.f32.mrb[18].mxu0 }
 0x506   :  { %v3106_v26 = vpop.f32.mrb[19].mxu0 }
 0x50b   :  { %v1943_v22 = vpop.f32.mrb[20].mxu0  ;;  %v1989_v12 = vpop.f32.mrb[36].mxu1 }
 0x50c   :  { %v2087_v28 = vcombine.low %v1759_v11, %v1943_v22  ;;  %v2088_v33 = vcombine.high %v1759_v11, %v1943_v22  ;;  %v2155_v36 = vcombine.low %v1805_v0, %v1989_v12  ;;  %v2156_v16 = vcombine.high %v1805_v0, %v1989_v12  ;;  %v3117_v17 = vpop.f32.mrb[21].mxu0  ;;  %v3123_v18 = vpop.f32.mrb[37].mxu1 }
 0x50d   :  { %v1946_v37 = vpop.f32.mrb[22].mxu0  ;;  %v1992_v39 = vpop.f32.mrb[38].mxu1 }
 0x50e   :  { %v3118_v40 = vpop.f32.mrb[23].mxu0  ;;  %v3124_v8 = vpop.f32.mrb[39].mxu1  ;;  %v2095_v44 = vrot.slane %v2087_v28, %v3579_v56  ;;  %v2102_v55 = vrot.slane %v2088_v33, %v3579_v56  ;;  %v2163_v3 = vrot.slane %v2155_v36, %v3579_v56  ;;  %v2170_v38 = vrot.slane %v2156_v16, %v3579_v56  ;;  %v3227_v28 = vld [vmem:[#allocation4 + $0x30] sm:$0xff]  }
 0x50f   :  { %3150 = vmatpush3.bf16.msra.mxu0 %v3227_v28  ;;  %v3247_v28 = vld [vmem:[#allocation6 + $0x60] ss:$8 sps:$4 sm:$0xff]  }
 0x510   :  { %3151 = vmatprep.subr.bf16.mxu0 %v3408_v21 }
 0x513   :  { %v2035_v24 = vpop.f32.mrb[24].mxu0  ;;  %v2081_v41 = vpop.f32.mrb[40].mxu1 }
 0x514   :  { %v2103_v45 = vcombine.low %v1851_v59, %v2035_v24  ;;  %v2104_v50 = vcombine.high %v1851_v59, %v2035_v24  ;;  %v2171_v51 = vcombine.low %v1897_v43, %v2081_v41  ;;  %v2172_v52 = vcombine.high %v1897_v43, %v2081_v41  ;;  %v3129_v53 = vpop.f32.mrb[25].mxu0  ;;  %v3135_v54 = vpop.f32.mrb[41].mxu1 }
 0x515   :  { %v2038_v29 = vpop.f32.mrb[26].mxu0  ;;  %v2084_v42 = vpop.f32.mrb[42].mxu1 }
 0x516   :  { %v2111_v62 = vrot.slane %v2103_v45, %v3579_v56  ;;  %v2118_v57 = vrot.slane %v2104_v50, %v3579_v56  ;;  %v2179_v58 = vrot.slane %v2171_v51, %v3579_v56  ;;  %v2186_v60 = vrot.slane %v2172_v52, %v3579_v56  ;;  %v3130_v46 = vpop.f32.mrb[27].mxu0  ;;  %v3136_v47 = vpop.f32.mrb[43].mxu1  ;;  %v3228_v29 = vld [vmem:[#allocation4 + $0x38] sm:$0xff]  }
 0x517   :  { %3152 = vmatpush3.bf16.msra.mxu0 %v3228_v29 }
 0x518   :  { %v2119_v35 = vcombine.low %v2095_v44, %v2111_v62  ;;  %v2120_v32 = vcombine.high %v2095_v44, %v2111_v62  ;;  %v2135_v4 = vcombine.low %v2102_v55, %v2118_v57  ;;  %v2136_v49 = vcombine.high %v2102_v55, %v2118_v57 }
 0x519   :  { %v2187_v27 = vcombine.low %v2163_v3, %v2179_v58  ;;  %v2188_v61 = vcombine.high %v2163_v3, %v2179_v58  ;;  %v2203_v5 = vcombine.low %v2170_v38, %v2186_v60  ;;  %v2204_v6 = vcombine.high %v2170_v38, %v2186_v60  ;;  %v3229_v3 = vld [vmem:[#allocation6] ss:$8 sps:$4 sm:$0xff]   ;;  %v3231_v38 = vld [vmem:[#allocation6 + $0x4] ss:$8 sps:$4 sm:$0xff]  }
 0x51a   :  { %v2127_v48 = vrot.slane %v2119_v35, %v3582_v2  ;;  %v2134_v63 = vrot.slane %v2120_v32, %v3582_v2  ;;  %v2143_v0 = vrot.slane %v2135_v4, %v3582_v2  ;;  %v2150_v1 = vrot.slane %v2136_v49, %v3582_v2  ;;  %v3234_v35 = vld [vmem:[#allocation6 + $0x14] ss:$8 sps:$4 sm:$0xff]   ;;  %2615 = vmatprep.subr.bf16.mxu1 %v3231_v38 }
 0x51b   :  { %v2195_v9 = vrot.slane %v2187_v27, %v3582_v2  ;;  %v2202_v10 = vrot.slane %v2188_v61, %v3582_v2  ;;  %v2211_v11 = vrot.slane %v2203_v5, %v3582_v2  ;;  %v2218_v13 = vrot.slane %v2204_v6, %v3582_v2  ;;  %2616 = vmatpush1.bf16.msra.mxu1 %v3229_v3  ;;  %v3232_v27 = vld [vmem:[#allocation6 + $0x10] ss:$8 sps:$4 sm:$0xff]   ;;  %v3235_v61 = vld [vmem:[#allocation6 + $0x20] ss:$8 sps:$4 sm:$0xff]   ;;  %v3240_v5 = vld [vmem:[#allocation6 + $0x34] ss:$8 sps:$4 sm:$0xff]  }
 0x51c   :  { %v2223_v14 = vcombine.low %v2127_v48, %v2134_v63  ;;  %v2903_v15 = vcombine.high %v2127_v48, %v2134_v63  ;;  %v2239_v43 = vcombine.low %v2143_v0, %v2150_v1  ;;  %v2904_v7 = vcombine.high %v2143_v0, %v2150_v1  ;;  %2617 = vmatprep.subr.bf16.mxu1 %v3234_v35  ;;  %v3238_v6 = vld [vmem:[#allocation6 + $0x30] ss:$8 sps:$4 sm:$0xff]   ;;  %v3243_v48 = vld [vmem:[#allocation6 + $0x44] ss:$8 sps:$4 sm:$0xff]   ;;  %v3241_v63 = vld [vmem:[#allocation6 + $0x40] ss:$8 sps:$4 sm:$0xff]  }
 0x51d   :  { %v2291_v19 = vcombine.low %v2195_v9, %v2202_v10  ;;  %v2905_v20 = vcombine.high %v2195_v9, %v2202_v10  ;;  %v2307_v59 = vcombine.low %v2211_v11, %v2218_v13  ;;  %v2906_v23 = vcombine.high %v2211_v11, %v2218_v13  ;;  %v3246_v0 = vld [vmem:[#allocation6 + $0x54] ss:$8 sps:$4 sm:$0xff]   ;;  %v3244_v1 = vld [vmem:[#allocation6 + $0x50] ss:$8 sps:$4 sm:$0xff]   ;;  %v2523_v35 = vld [vmem:[%s4001_s6] sm:$0x3] }
 0x51e   :  { %v2230_v25 = vrot.slane %v2223_v14, %v3579_v56  ;;  %v2238_v26 = vrot.slane %v2903_v15, %v3579_v56  ;;  %v2246_v22 = vrot.slane %v2239_v43, %v3579_v56  ;;  %v2254_v12 = vrot.slane %v2904_v7, %v3579_v56  ;;  %v3267_v3 = vld [vmem:[#allocation7 + $0x78] sm:$0xff]  }
 0x51f   :  { %v2298_v33 = vrot.slane %v2291_v19, %v3579_v56  ;;  %v2306_v36 = vrot.slane %v2905_v20, %v3579_v56  ;;  %v2314_v16 = vrot.slane %v2307_v59, %v3579_v56  ;;  %v2322_v17 = vrot.slane %v2906_v23, %v3579_v56  ;;  %2618 = vmatpush1.bf16.msra.mxu1 %v3232_v27  ;;  %v3268_v38 = vld [vmem:[#allocation7 + $0x38] sm:$0xff]  }
 0x520   :  { %v2256_v18 = vcombine.high %v2230_v25, %v2238_v26  ;;  %v2272_v37 = vcombine.high %v2246_v22, %v2254_v12  ;;  %v2255_v39 = vcombine.low %v2230_v25, %v2238_v26  ;;  %v2271_v40 = vcombine.low %v2246_v22, %v2254_v12 }
 0x521   :  { %v2324_v8 = vcombine.high %v2298_v33, %v2306_v36  ;;  %v2340_v24 = vcombine.high %v2314_v16, %v2322_v17  ;;  %v2323_v41 = vcombine.low %v2298_v33, %v2306_v36  ;;  %v2339_v45 = vcombine.low %v2314_v16, %v2322_v17  ;;  %v3249_v33 = vld [vmem:[#allocation6 + $0x64] ss:$8 sps:$4 sm:$0xff]   ;;  %v3250_v36 = vld [vmem:[#allocation6 + $0x70] ss:$8 sps:$4 sm:$0xff]   ;;  %v3252_v16 = vld [vmem:[#allocation6 + $0x74] ss:$8 sps:$4 sm:$0xff]  }
 0x522   :  { %v2270_v50 = vrot.slane %v2256_v18, %v3582_v2  ;;  %v2286_v51 = vrot.slane %v2272_v37, %v3582_v2  ;;  %v2263_v52 = vrot.slane %v2255_v39, %v3582_v2  ;;  %v2279_v53 = vrot.slane %v2271_v40, %v3582_v2  ;;  %v3253_v17 = vld [vmem:[#allocation7 + $0x40] sm:$0xff]   ;;  %v3255_v37 = vld [vmem:[#allocation7 + $0x48] sm:$0xff]   ;;  %v3257_v40 = vld [vmem:[#allocation7 + $0x50] sm:$0xff]  }
 0x523   :  { %v2338_v56 = vrot.slane %v2324_v8, %v3582_v2  ;;  %v2354_v54 = vrot.slane %v2340_v24, %v3582_v2  ;;  %v2331_v44 = vrot.slane %v2323_v41, %v3582_v2  ;;  %v2347_v55 = vrot.slane %v2339_v45, %v3582_v2  ;;  %v3237_v2 = vld [vmem:[#allocation6 + $0x24] ss:$8 sps:$4 sm:$0xff]   ;;  %2999 = vmatprep.subr.bf16.mxu0 %v3253_v17  ;;  %v3258_v8 = vld [vmem:[#allocation7 + $0x10] sm:$0xff]   ;;  %v3259_v24 = vld [vmem:[#allocation7 + $0x58] sm:$0xff]  }
 0x524   :  { %v2289_v42 = vcombine.low %v2270_v50, %v2286_v51  ;;  %v2288_v62 = vcombine.high %v2263_v52, %v2279_v53  ;;  %v2287_v21 = vcombine.low %v2263_v52, %v2279_v53  ;;  %v2290_v57 = vcombine.high %v2270_v50, %v2286_v51  ;;  %2619 = vmatprep.subr.bf16.mxu1 %v3237_v2  ;;  %v3254_v18 = vld [vmem:[#allocation7] sm:$0xff]   ;;  %v3256_v39 = vld [vmem:[#allocation7 + $0x8] sm:$0xff]   ;;  %v3260_v41 = vld [vmem:[#allocation7 + $0x18] sm:$0xff]  }
 0x525   :  { %v2357_v58 = vcombine.low %v2338_v56, %v2354_v54  ;;  %v2355_v60 = vcombine.low %v2331_v44, %v2347_v55  ;;  %v2356_v46 = vcombine.high %v2331_v44, %v2347_v55  ;;  %v2358_v47 = vcombine.high %v2338_v56, %v2354_v54  ;;  %2620 = vmatpush1.bf16.msra.mxu1 %v3235_v61  ;;  %v3261_v45 = vld [vmem:[#allocation7 + $0x60] sm:$0xff]   ;;  %v3263_v51 = vld [vmem:[#allocation7 + $0x68] sm:$0xff]  }
 0x526   :  { %2621 = vmatprep.subr.bf16.mxu1 %v3240_v5  ;;  %v3262_v50 = vld [vmem:[#allocation7 + $0x20] sm:$0xff]  }
 0x527   :  { %v3179_v32 = vpack.i.bf16 %v2357_v58, %v2289_v42  ;;  %v3174_v4 = vpack.i.bf16 %v2356_v46, %v2288_v62  ;;  %v3184_v49 = vpack.i.bf16 %v2358_v47, %v2290_v57  ;;  %v2907_v52 = vld [vmem:[%s3999_s4] ss:$0 sm:$0xff]  ;;  %v3265_v46 = vld [vmem:[#allocation7 + $0x70] sm:$0xff]  }
 0x528   :  { %v3301_v42 = vld [vmem:[%s3995_s0] sm:$0xff]  ;;  %v3266_v47 = vld [vmem:[#allocation7 + $0x30] sm:$0xff]  }
 0x529   :  { %3180 = vrot.lane.b32.xlu0 %v3179_v32, %s3398_s19  ;;  %3175 = vrot.lane.b32.xlu1 %v3174_v4, %s3411_s2  ;;  %v2528_v32 = vrot.slane %v2523_v35, %v127_v31  ;;  %v2532_v4 = vrot.slane %v2523_v35, %v131_v34 }
 0x52a   :  { %2622 = vmatpush1.bf16.msra.mxu1 %v3238_v6 }
 0x52b   :  { %2623 = vmatprep.subr.bf16.mxu1 %v3243_v48 }
 0x52d   :  { %3185 = vrot.lane.b32.xlu1 %v3184_v49, %s3410_s26 }
 0x52e   :  { %2624 = vmatpush1.bf16.msra.mxu1 %v3241_v63 }
 0x52f   :  { %2625 = vmatprep.subr.bf16.mxu1 %v3246_v0 }
 0x532   :  { %2626 = vmatpush1.bf16.msra.mxu1 %v3244_v1 }
 0x533   :  { %2627 = vmatprep.subr.bf16.mxu1 %v3249_v33 }
 0x536   :  { %2628 = vmatpush1.bf16.msra.mxu1 %v3247_v28 }
 0x537   :  { %2629 = vmatprep.subr.bf16.mxu1 %v3252_v16 }
 0x53a   :  { %2630 = vmatpush1.bf16.msra.mxu1 %v3250_v36 }
 0x59b   :  { %v3181_v9 = vpop.permute.xlu0 %3180  ;;  %v3176_v10 = vpop.permute.xlu1 %3175 }
 0x59c   :  { %v3178_v11 = vunpack.i.h.bf16 %v3176_v10  ;;  %v3177_v13 = vunpack.i.l.bf16 %v3176_v10  ;;  %v3183_v14 = vunpack.i.h.bf16 %v3181_v9  ;;  %v3182_v15 = vunpack.i.l.bf16 %v3181_v9 }
 0x59e   :  { %v2384_v43 = vsel %vm1252_vm1, %v2355_v60, %v3178_v11  ;;  %v2383_v7 = vsel %vm1252_vm1, %v2287_v21, %v3177_v13  ;;  %v3302_v21 = vld [vmem:[%s3995_s0 + $0x8] sm:$0xff] }
 0x59f   :  { %v3186_v19 = vpop.permute.xlu1 %3185  ;;  %v2386_v23 = vsel %vm2385_vm4, %v2383_v7, %v3182_v15  ;;  %v2387_v25 = vsel %vm2385_vm4, %v2384_v43, %v3183_v14  ;;  %v3264_v60 = vld [vmem:[#allocation7 + $0x28] sm:$0xff]  }
 0x5a0   :  { %v3188_v20 = vunpack.i.h.bf16 %v3186_v19  ;;  %v3187_v59 = vunpack.i.l.bf16 %v3186_v19 }
 0x5a2   :  { %v2389_v26 = vsel %vm2388_vm5, %v2386_v23, %v3187_v59  ;;  %v2390_v22 = vsel %vm2388_vm5, %v2387_v25, %v3188_v20 }
 0x5a3   :  { %v2391_v12 = vpack.c.bf16 %v2390_v22, %v2389_v26 }
 0x5a5   :  { %3154 = vmatmul.mubr.bf16.vlgmr.msra.gmra.mrb[28].mxu0 %v2391_v12 }
 0x5a6   :  { %3000 = vmatpush3.bf16.msra.mxu0 %v3254_v18 }
 0x5a7   :  { %3001 = vmatprep.subr.bf16.mxu0 %v3255_v37 }
 0x5aa   :  { %3002 = vmatpush3.bf16.msra.mxu0 %v3256_v39 }
 0x5ab   :  { %3003 = vmatprep.subr.bf16.mxu0 %v3257_v40 }
 0x5ae   :  { %3004 = vmatpush3.bf16.msra.mxu0 %v3258_v8 }
 0x5af   :  { %3005 = vmatprep.subr.bf16.mxu0 %v3259_v24 }
 0x5b2   :  { %3006 = vmatpush3.bf16.msra.mxu0 %v3260_v41 }
 0x5b3   :  { %3007 = vmatprep.subr.bf16.mxu0 %v3261_v45 }
 0x5b6   :  { %3008 = vmatpush3.bf16.msra.mxu0 %v3262_v50 }
 0x5b7   :  { %3009 = vmatprep.subr.bf16.mxu0 %v3263_v51 }
 0x5ba   :  { %3010 = vmatpush3.bf16.msra.mxu0 %v3264_v60 }
 0x5bb   :  { %3011 = vmatprep.subr.bf16.mxu0 %v3265_v46 }
 0x5be   :  { %3012 = vmatpush3.bf16.msra.mxu0 %v3266_v47 }
 0x5bf   :  { %3013 = vmatprep.subr.bf16.mxu0 %v3267_v3 }
 0x5c2   :  { %3014 = vmatpush3.bf16.msra.mxu0 %v3268_v38 }
 0x678   :  { %v2497_v53 = vpop.f32.mrb[28].mxu0 }
 0x679   :  { %v2498_v56 = vadd.f32 %v2907_v52, %v2497_v53  ;;  %v3155_v54 = vpop.f32.mrb[29].mxu0 }
 0x67a   :  { %v2500_v44 = vpop.f32.mrb[30].mxu0 }
 0x67b   :  { %v2501_v55 = vadd.f32 %v2907_v52, %v2500_v44  ;;  %v3156_v29 = vpop.f32.mrb[31].mxu0  ;;  %v2504_v62 = vadd.f32 %v3301_v42, %v2498_v56 }
 0x67d   :  { %v2505_v57 = vadd.f32 %v3302_v21, %v2501_v55 }
 0x67f   :  { %v2506_v58 = vpack.c.bf16 %v2505_v57, %v2504_v62 }
 0x681   :  { %2648 = vmatmul.mubr.bf16.vlgmr.msra.gmra.mrb[44].mxu1 %v2506_v58 }
 0x754   :  { %v2649_v49 = vpop.f32.mrb[44].mxu1 }
 0x755   :  { %v2650_v27 = vadd.f32 %v2649_v49, %v2528_v32  ;;  %v2651_v2 = vpop.f32.mrb[45].mxu1 }
 0x756   :  { %v2652_v61 = vadd.f32 %v2651_v2, %v2532_v4  ;;  %v2653_v5 = vpop.f32.mrb[46].mxu1 }
 0x757   :  { %v2654_v6 = vadd.f32 %v2653_v5, %v2528_v32  ;;  %v2655_v48 = vpop.f32.mrb[47].mxu1  ;;  %v2658_v0 = vmax.f32 %v2650_v27, 0.0 }
 0x758   :  { %v2656_v63 = vadd.f32 %v2655_v48, %v2532_v4  ;;  %v2659_v9 = vmax.f32 %v2652_v61, 0.0 }
 0x759   :  { %v2660_v1 = vmax.f32 %v2654_v6, 0.0 }
 0x75a   :  { %v2661_v10 = vmax.f32 %v2656_v63, 0.0 }
 0x75b   :  { %v2662_v11 = vpack.c.bf16 %v2660_v1, %v2658_v0 }
 0x75c   :  { %v2663_v13 = vpack.c.bf16 %v2661_v10, %v2659_v9 }
 0x75e   :  { %2831 = vmatprep.mubr.bf16.mxu0 %v2663_v13 }
 0x75f   :  { %2832 = vmatmul.mubr.bf16.vlgmr.msra.gmra.mrb[32].mxu0 %v2662_v11 }
 0x832   :  { %v3015_v31 = vpop.f32.mrb[32].mxu0 }
 0x833   :  { %v3016_v34 = vpop.f32.mrb[33].mxu0 }
 0x834   :  { %v3017_v14 = vadd.f32 %v3016_v34, %v3015_v31  ;;  %v3018_v15 = vpop.f32.mrb[34].mxu0 }
 0x835   :  { %v3019_v43 = vpop.f32.mrb[35].mxu0 }
 0x836   :  { %v2834_v7 = vadd.f32 %v3017_v14, %v2932_v30  ;;  %v3020_v19 = vadd.f32 %v3019_v43, %v3018_v15 }
 0x838   :  { %v2840_v20 = vadd.f32 %v2834_v7, %v2504_v62  ;;  %v2837_v59 = vadd.f32 %v3020_v19, %v2932_v30 }
 0x83a   :  { %2842 = vst [vmem:[%s4004_s9] sm:$0xff] %v2840_v20  ;;  %v2841_v23 = vadd.f32 %v2837_v59, %v2505_v57 }
 0x83c   :  { %2843 = vst [vmem:[%s4004_s9 + $0x8] sm:$0xff] %v2841_v23 }
 0x83d   :  { %2848 = vsyncpa [#allocation3], 1 }
 0x83e   :  { %2849 = vsyncpa [#allocation5], 1 }
 0x83f   :  { %2850 = vsyncpa [#allocation8], 1 }

</bundles_post_ra>
